<compile_context>
chip_gen: v7x
topology: tpu7x:2x2x1
jax: 0.10.0
libtpu: 0.0.40
codegen_flags: <defaults>
</compile_context>

<pallas_src>
import functools
import math

import jax
import jax.numpy as jnp
from jax.experimental import pallas as pl
from jax.experimental.pallas import tpu as pltpu

LANE = 128
VMEM_LIMIT = 32 * 1024 * 1024


def _round_up(n, m):
    return ((n + m - 1) // m) * m


# ------------------------- in-kernel building blocks -------------------------

def _mm(x, w_bf16, b=None):
    """bf16 MXU matmul with f32 accumulation (+ optional f32 bias)."""
    y = jnp.dot(x.astype(jnp.bfloat16), w_bf16, preferred_element_type=jnp.float32)
    return y if b is None else y + b


def _softmax_attn(q, k, v, scale, causal):
    """f32 softmax attention; scores via dot_general (no K transpose)."""
    s = jax.lax.dot_general(
        q.astype(jnp.bfloat16), k.astype(jnp.bfloat16),
        (((1,), (1,)), ((), ())), preferred_element_type=jnp.float32) * scale
    if causal:
        sq, sk = s.shape
        row = jax.lax.broadcasted_iota(jnp.int32, (sq, sk), 0)
        col = jax.lax.broadcasted_iota(jnp.int32, (sq, sk), 1)
        s = jnp.where(row >= col, s, -1e30)
    s = s - jnp.max(s, axis=-1, keepdims=True)
    p = jnp.exp(s)
    p = p * pl.reciprocal(jnp.sum(p, axis=-1, keepdims=True), approx=True)
    return jnp.dot(p.astype(jnp.bfloat16), v.astype(jnp.bfloat16),
                   preferred_element_type=jnp.float32)


def _ln_residual(x, r, g, b, e_true):
    """LayerNorm(x + r) over the first e_true lanes (padding lanes are zero)."""
    h = x + r
    inv_e = 1.0 / e_true
    mu = jnp.sum(h, axis=-1, keepdims=True) * inv_e
    ms = jnp.sum(h * h, axis=-1, keepdims=True) * inv_e
    var = jnp.maximum(ms - mu * mu, 0.0)
    return (h - mu) * jax.lax.rsqrt(var + 1e-5) * g + b


# ------------------------------ Pallas kernels -------------------------------

def _encoder_layer_kernel(x_ref,
                          wqkv_ref, bqkv_ref, wo_ref, bo_ref,
                          ln1_g_ref, ln1_b_ref,
                          w1_ref, b1_ref, w2_ref, b2_ref,
                          ln2_g_ref, ln2_b_ref,
                          o_ref, *, e_true, scale):
    x = x_ref[0]                               # (S, Ep) f32
    ep = x.shape[-1]
    # fused Q/K/V projection
    qkv = _mm(x, wqkv_ref[...], bqkv_ref[...])
    q, k, v = qkv[:, :ep], qkv[:, ep:2 * ep], qkv[:, 2 * ep:]
    # self-attention (no mask) + output projection
    a = _softmax_attn(q, k, v, scale, causal=False)
    attn = _mm(a, wo_ref[...], bo_ref[...])
    h1 = _ln_residual(x, attn, ln1_g_ref[...], ln1_b_ref[...], e_true)
    # feed-forward
    f = jnp.maximum(_mm(h1, w1_ref[...], b1_ref[...]), 0.0)
    f = _mm(f, w2_ref[...], b2_ref[...])
    o_ref[0] = _ln_residual(h1, f, ln2_g_ref[...], ln2_b_ref[...], e_true)


def _decoder_layer_kernel(x_ref, enc_ref,
                          swqkv_ref, sbqkv_ref, swo_ref, sbo_ref,
                          ln1_g_ref, ln1_b_ref,
                          cwq_ref, cbq_ref, cwkv_ref, cbkv_ref, cwo_ref, cbo_ref,
                          ln2_g_ref, ln2_b_ref,
                          w1_ref, b1_ref, w2_ref, b2_ref,
                          ln3_g_ref, ln3_b_ref,
                          o_ref, *, e_true, scale):
    x = x_ref[0]                               # (Sd, Ep)
    enc = enc_ref[0]                           # (Se, Ep)
    ep = x.shape[-1]
    # ---- causal self-attention ----
    qkv = _mm(x, swqkv_ref[...], sbqkv_ref[...])
    q, k, v = qkv[:, :ep], qkv[:, ep:2 * ep], qkv[:, 2 * ep:]
    a = _softmax_attn(q, k, v, scale, causal=True)
    attn = _mm(a, swo_ref[...], sbo_ref[...])
    h1 = _ln_residual(x, attn, ln1_g_ref[...], ln1_b_ref[...], e_true)
    # ---- cross-attention (no mask) ----
    q2 = _mm(h1, cwq_ref[...], cbq_ref[...])
    kv = _mm(enc, cwkv_ref[...], cbkv_ref[...])
    k2, v2 = kv[:, :ep], kv[:, ep:]
    a2 = _softmax_attn(q2, k2, v2, scale, causal=False)
    cattn = _mm(a2, cwo_ref[...], cbo_ref[...])
    h2 = _ln_residual(h1, cattn, ln2_g_ref[...], ln2_b_ref[...], e_true)
    # ---- feed-forward ----
    f = jnp.maximum(_mm(h2, w1_ref[...], b1_ref[...]), 0.0)
    f = _mm(f, w2_ref[...], b2_ref[...])
    o_ref[0] = _ln_residual(h2, f, ln3_g_ref[...], ln3_b_ref[...], e_true)


def _logits_kernel(x_ref, w_ref, b_ref, o_ref):
    o_ref[0] = _mm(x_ref[0], w_ref[...], b_ref[...])


# ------------------------------ Pallas wrappers -------------------------------

def _full_spec(arr):
    nd = arr.ndim
    return pl.BlockSpec(arr.shape, lambda b: (0,) * nd)


def _cparams():
    return pltpu.CompilerParams(dimension_semantics=("parallel",),
                                vmem_limit_bytes=VMEM_LIMIT)


def encoder_layer_call(x, p, *, e_true):
    B, S, Ep = x.shape
    kernel = functools.partial(_encoder_layer_kernel, e_true=e_true,
                               scale=1.0 / math.sqrt(e_true))
    weights = [p["wqkv"], p["bqkv"], p["wo"], p["bo"],
               p["ln1_g"], p["ln1_b"],
               p["w1"], p["b1"], p["w2"], p["b2"],
               p["ln2_g"], p["ln2_b"]]
    return pl.pallas_call(
        kernel,
        out_shape=jax.ShapeDtypeStruct((B, S, Ep), jnp.float32),
        grid=(B,),
        in_specs=[pl.BlockSpec((1, S, Ep), lambda b: (b, 0, 0))]
                 + [_full_spec(w) for w in weights],
        out_specs=pl.BlockSpec((1, S, Ep), lambda b: (b, 0, 0)),
        compiler_params=_cparams(),
    )(x, *weights)


def decoder_layer_call(x, enc_out, p, *, e_true):
    B, Sd, Ep = x.shape
    Se = enc_out.shape[1]
    kernel = functools.partial(_decoder_layer_kernel, e_true=e_true,
                               scale=1.0 / math.sqrt(e_true))
    weights = [p["swqkv"], p["sbqkv"], p["swo"], p["sbo"],
               p["ln1_g"], p["ln1_b"],
               p["cwq"], p["cbq"], p["cwkv"], p["cbkv"], p["cwo"], p["cbo"],
               p["ln2_g"], p["ln2_b"],
               p["w1"], p["b1"], p["w2"], p["b2"],
               p["ln3_g"], p["ln3_b"]]
    return pl.pallas_call(
        kernel,
        out_shape=jax.ShapeDtypeStruct((B, Sd, Ep), jnp.float32),
        grid=(B,),
        in_specs=[pl.BlockSpec((1, Sd, Ep), lambda b: (b, 0, 0)),
                  pl.BlockSpec((1, Se, Ep), lambda b: (b, 0, 0))]
                 + [_full_spec(w) for w in weights],
        out_specs=pl.BlockSpec((1, Sd, Ep), lambda b: (b, 0, 0)),
        compiler_params=_cparams(),
    )(x, enc_out, *weights)


def logits_call(x, w, b):
    B, S, Ep = x.shape
    Op = w.shape[1]
    return pl.pallas_call(
        _logits_kernel,
        out_shape=jax.ShapeDtypeStruct((B, S, Op), jnp.float32),
        grid=(B,),
        in_specs=[pl.BlockSpec((1, S, Ep), lambda b: (b, 0, 0)),
                  _full_spec(w), _full_spec(b)],
        out_specs=pl.BlockSpec((1, S, Op), lambda b: (b, 0, 0)),
        compiler_params=_cparams(),
    )(x, w, b)


# ------------------------------ Model definition ------------------------------

def sinusoidal_pe(max_len, emb):
    pos = jnp.arange(max_len, dtype=jnp.float32)[:, None]
    i = jnp.arange(0, emb, 2, dtype=jnp.float32)[None, :]
    div = jnp.exp(-math.log(10000.0) * i / emb)
    pe = jnp.zeros((max_len, emb), dtype=jnp.float32)
    pe = pe.at[:, 0::2].set(jnp.sin(pos * div))
    pe = pe.at[:, 1::2].set(jnp.cos(pos * div))
    return pe


def init_params(key, ec_vocab, dc_vocab, output_size, emb, hidden, max_len):
    keys = iter(jax.random.split(key, 64))
    nrm = lambda shape: (0.02 * jax.random.normal(next(keys), shape)).astype(jnp.float32)

    def linear_p(din, dout):
        return {"w": nrm((din, dout)), "b": jnp.zeros((dout,), jnp.float32)}

    def ln_p(d):
        return {"g": jnp.ones((d,), jnp.float32), "b": jnp.zeros((d,), jnp.float32)}

    def attn_p():
        return {"q": linear_p(emb, emb), "k": linear_p(emb, emb),
                "v": linear_p(emb, emb), "o": linear_p(emb, emb)}

    return {
        "emb_enc": nrm((ec_vocab, emb)),
        "emb_dec": nrm((dc_vocab, emb)),
        "pe": sinusoidal_pe(max_len, emb),
        "enc_layer": {
            "attn": attn_p(), "ln1": ln_p(emb),
            "ffn1": linear_p(emb, hidden), "ffn2": linear_p(hidden, emb),
            "ln2": ln_p(emb),
        },
        "dec_layer": {
            "self_attn": attn_p(), "ln1": ln_p(emb),
            "cross_attn": attn_p(), "ln2": ln_p(emb),
            "ffn1": linear_p(emb, hidden), "ffn2": linear_p(hidden, emb),
            "ln3": ln_p(emb),
        },
        "out_proj": linear_p(emb, output_size),
    }


def pack_params(raw, emb, hidden, out_size):
    """Pad lane dims to 128, cast matmul weights to bf16, fuse Q/K/V (and K/V)."""
    Ep = _round_up(emb, LANE)
    Hp = _round_up(hidden, LANE)
    Op = _round_up(out_size, LANE)

    def pw(w, r, c):  # zero-pad weight to (r, c), bf16 for the MXU
        return jnp.pad(w, ((0, r - w.shape[0]), (0, c - w.shape[1]))).astype(jnp.bfloat16)

    def pv(v, c):     # zero-pad vector to (1, c), keep f32
        return jnp.pad(v, (0, c - v.shape[0])).reshape(1, c).astype(jnp.float32)

    def pack_qkv(a):
        wqkv = jnp.concatenate([pw(a["q"]["w"], Ep, Ep), pw(a["k"]["w"], Ep, Ep),
                                pw(a["v"]["w"], Ep, Ep)], axis=1)
        bqkv = jnp.concatenate([pv(a["q"]["b"], Ep), pv(a["k"]["b"], Ep),
                                pv(a["v"]["b"], Ep)], axis=1)
        return wqkv, bqkv, pw(a["o"]["w"], Ep, Ep), pv(a["o"]["b"], Ep)

    e = raw["enc_layer"]
    wqkv, bqkv, wo, bo = pack_qkv(e["attn"])
    enc_layer = dict(
        wqkv=wqkv, bqkv=bqkv, wo=wo, bo=bo,
        ln1_g=pv(e["ln1"]["g"], Ep), ln1_b=pv(e["ln1"]["b"], Ep),
        w1=pw(e["ffn1"]["w"], Ep, Hp), b1=pv(e["ffn1"]["b"], Hp),
        w2=pw(e["ffn2"]["w"], Hp, Ep), b2=pv(e["ffn2"]["b"], Ep),
        ln2_g=pv(e["ln2"]["g"], Ep), ln2_b=pv(e["ln2"]["b"], Ep),
    )

    d = raw["dec_layer"]
    swqkv, sbqkv, swo, sbo = pack_qkv(d["self_attn"])
    ca = d["cross_attn"]
    cwkv = jnp.concatenate([pw(ca["k"]["w"], Ep, Ep), pw(ca["v"]["w"], Ep, Ep)], axis=1)
    cbkv = jnp.concatenate([pv(ca["k"]["b"], Ep), pv(ca["v"]["b"], Ep)], axis=1)
    dec_layer = dict(
        swqkv=swqkv, sbqkv=sbqkv, swo=swo, sbo=sbo,
        ln1_g=pv(d["ln1"]["g"], Ep), ln1_b=pv(d["ln1"]["b"], Ep),
        cwq=pw(ca["q"]["w"], Ep, Ep), cbq=pv(ca["q"]["b"], Ep),
        cwkv=cwkv, cbkv=cbkv,
        cwo=pw(ca["o"]["w"], Ep, Ep), cbo=pv(ca["o"]["b"], Ep),
        ln2_g=pv(d["ln2"]["g"], Ep), ln2_b=pv(d["ln2"]["b"], Ep),
        w1=pw(d["ffn1"]["w"], Ep, Hp), b1=pv(d["ffn1"]["b"], Hp),
        w2=pw(d["ffn2"]["w"], Hp, Ep), b2=pv(d["ffn2"]["b"], Ep),
        ln3_g=pv(d["ln3"]["g"], Ep), ln3_b=pv(d["ln3"]["b"], Ep),
    )

    return dict(
        emb_enc=jnp.pad(raw["emb_enc"], ((0, 0), (0, Ep - emb))),
        emb_dec=jnp.pad(raw["emb_dec"], ((0, 0), (0, Ep - emb))),
        pe=jnp.pad(raw["pe"], ((0, 0), (0, Ep - emb))),
        enc_layer=enc_layer, dec_layer=dec_layer,
        out_w=pw(raw["out_proj"]["w"], Ep, Op),
        out_b=pv(raw["out_proj"]["b"], Op),
    )


def transformer_forward(packed, enc_ids, dec_ids, *, e_true, out_true):
    # embedding gather + PE add: plain-JAX glue (XLA fuses; hidden under DMA)
    enc_x = packed["emb_enc"][enc_ids] + packed["pe"][: enc_ids.shape[1]]
    dec_x = packed["emb_dec"][dec_ids] + packed["pe"][: dec_ids.shape[1]]

    enc_out = encoder_layer_call(enc_x, packed["enc_layer"], e_true=e_true)  # num_layers=1
    dec_out = decoder_layer_call(dec_x, enc_out, packed["dec_layer"], e_true=e_true)
    logits = logits_call(dec_out, packed["out_w"], packed["out_b"])
    return logits[..., :out_true]


# ------------------------- pure-JAX f32 reference ----------------------------

def reference_forward(raw, enc_ids, dec_ids, emb):
    scale = 1.0 / math.sqrt(emb)
    lin = lambda x, p: x @ p["w"] + p["b"]

    def ln(x, p):
        mu = jnp.mean(x, -1, keepdims=True)
        var = jnp.mean((x - mu) ** 2, -1, keepdims=True)
        return (x - mu) * jax.lax.rsqrt(var + 1e-5) * p["g"] + p["b"]

    def attn(xq, xkv, p, mask):
        q, k, v = lin(xq, p["q"]), lin(xkv, p["k"]), lin(xkv, p["v"])
        s = jnp.einsum("bqe,bke->bqk", q, k) * scale
        if mask is not None:
            s = s + mask
        w = jax.nn.softmax(s, axis=-1)
        return lin(jnp.einsum("bqk,bke->bqe", w, v), p["o"])

    enc_x = raw["emb_enc"][enc_ids] + raw["pe"][: enc_ids.shape[1]]
    dec_x = raw["emb_dec"][dec_ids] + raw["pe"][: dec_ids.shape[1]]

    e = raw["enc_layer"]
    x = enc_x
    x = ln(x + attn(x, x, e["attn"], None), e["ln1"])
    x = ln(x + lin(jnp.maximum(lin(x, e["ffn1"]), 0.0), e["ffn2"]), e["ln2"])
    enc_out = x

    d = raw["dec_layer"]
    Sd = dec_ids.shape[1]
    causal = jnp.where(jnp.arange(Sd)[:, None] >= jnp.arange(Sd)[None, :], 0.0, -1e9)
    y = dec_x
    y = ln(y + attn(y, y, d["self_attn"], causal), d["ln1"])
    y = ln(y + attn(y, enc_out, d["cross_attn"], None), d["ln2"])
    y = ln(y + lin(jnp.maximum(lin(y, d["ffn1"]), 0.0), d["ffn2"]), d["ln3"])
    return lin(y, raw["out_proj"])


# ----------------------------------- main ------------------------------------

if __name__ == "__main__":
    EC_VOCAB, DC_VOCAB = 50, 60
    OUTPUT_SIZE = 16
    EMB, HIDDEN = 32, 64
    MAX_LEN = 128
    B, SE, SD = 2, 8, 8

    key = jax.random.PRNGKey(0)
    k_param, k_enc, k_dec = jax.random.split(key, 3)

    raw_params = init_params(k_param, EC_VOCAB, DC_VOCAB, OUTPUT_SIZE, EMB, HIDDEN, MAX_LEN)
    packed_params = pack_params(raw_params, EMB, HIDDEN, OUTPUT_SIZE)

    enc_ids = jax.random.randint(k_enc, (B, SE), 0, EC_VOCAB, dtype=jnp.int32)
    dec_ids = jax.random.randint(k_dec, (B, SD), 0, DC_VOCAB, dtype=jnp.int32)

    fwd = jax.jit(functools.partial(transformer_forward,
                                    e_true=EMB, out_true=OUTPUT_SIZE))
    logits = fwd(packed_params, enc_ids, dec_ids)
    jax.block_until_ready(logits)

    assert logits.shape == (B, SD, OUTPUT_SIZE)
    assert bool(jnp.all(jnp.isfinite(logits)))

    # correctness vs pure-JAX f32 reference (bf16 matmuls -> loose tolerance)
    ref = reference_forward(raw_params, enc_ids, dec_ids, EMB)
    max_err = float(jnp.max(jnp.abs(logits - ref)))
    assert max_err < 5e-2, f"mismatch vs f32 reference: {max_err}"

    print("KERNEL_OK")
</pallas_src>

<mosaic_0001>
module attributes {stable_mosaic.version = 11 : i64} {
  func.func @_encoder_layer_kernel(%arg0: i32, %arg1: memref<1x8x128xf32, #tpu.memory_space<vmem>>, %arg2: memref<128x384xbf16, #tpu.memory_space<vmem>>, %arg3: memref<1x384xf32, #tpu.memory_space<vmem>>, %arg4: memref<128x128xbf16, #tpu.memory_space<vmem>>, %arg5: memref<1x128xf32, #tpu.memory_space<vmem>>, %arg6: memref<1x128xf32, #tpu.memory_space<vmem>>, %arg7: memref<1x128xf32, #tpu.memory_space<vmem>>, %arg8: memref<128x128xbf16, #tpu.memory_space<vmem>>, %arg9: memref<1x128xf32, #tpu.memory_space<vmem>>, %arg10: memref<128x128xbf16, #tpu.memory_space<vmem>>, %arg11: memref<1x128xf32, #tpu.memory_space<vmem>>, %arg12: memref<1x128xf32, #tpu.memory_space<vmem>>, %arg13: memref<1x128xf32, #tpu.memory_space<vmem>>, %arg14: memref<1x8x128xf32, #tpu.memory_space<vmem>>) attributes {dimension_semantics = [#tpu.dimension_semantics<parallel>], iteration_bounds = array<i64: 2>, scalar_prefetch = 0 : i64, scratch_operands = 0 : i64, tpu.core_type = #tpu.core_type<tc>, window_params = [{transform_indices = @transform_0, window_bounds = array<i64: 1, 8, 128>}, {pipeline_mode = #tpu.pipeline_mode<synchronous>, transform_indices = @transform_1, window_bounds = array<i64: 128, 384>}, {pipeline_mode = #tpu.pipeline_mode<synchronous>, transform_indices = @transform_2, window_bounds = array<i64: 1, 384>}, {pipeline_mode = #tpu.pipeline_mode<synchronous>, transform_indices = @transform_3, window_bounds = array<i64: 128, 128>}, {pipeline_mode = #tpu.pipeline_mode<synchronous>, transform_indices = @transform_4, window_bounds = array<i64: 1, 128>}, {pipeline_mode = #tpu.pipeline_mode<synchronous>, transform_indices = @transform_5, window_bounds = array<i64: 1, 128>}, {pipeline_mode = #tpu.pipeline_mode<synchronous>, transform_indices = @transform_6, window_bounds = array<i64: 1, 128>}, {pipeline_mode = #tpu.pipeline_mode<synchronous>, transform_indices = @transform_7, window_bounds = array<i64: 128, 128>}, {pipeline_mode = #tpu.pipeline_mode<synchronous>, transform_indices = @transform_8, window_bounds = array<i64: 1, 128>}, {pipeline_mode = #tpu.pipeline_mode<synchronous>, transform_indices = @transform_9, window_bounds = array<i64: 128, 128>}, {pipeline_mode = #tpu.pipeline_mode<synchronous>, transform_indices = @transform_10, window_bounds = array<i64: 1, 128>}, {pipeline_mode = #tpu.pipeline_mode<synchronous>, transform_indices = @transform_11, window_bounds = array<i64: 1, 128>}, {pipeline_mode = #tpu.pipeline_mode<synchronous>, transform_indices = @transform_12, window_bounds = array<i64: 1, 128>}, {transform_indices = @transform_13, window_bounds = array<i64: 1, 8, 128>}]} {
    %c0 = arith.constant 0 : index
    %c0_0 = arith.constant 0 : index
    %c0_1 = arith.constant 0 : index
    %0 = vector.load %arg1[%c0, %c0_0, %c0_1] : memref<1x8x128xf32, #tpu.memory_space<vmem>>, vector<1x8x128xf32>
    %1 = vector.shape_cast %0 : vector<1x8x128xf32> to vector<8x128xf32>
    %c0_2 = arith.constant 0 : index
    %c0_3 = arith.constant 0 : index
    %2 = vector.load %arg2[%c0_2, %c0_3] : memref<128x384xbf16, #tpu.memory_space<vmem>>, vector<128x384xbf16>
    %c0_4 = arith.constant 0 : index
    %c0_5 = arith.constant 0 : index
    %3 = vector.load %arg3[%c0_4, %c0_5] : memref<1x384xf32, #tpu.memory_space<vmem>>, vector<1x384xf32>
    %4 = arith.truncf %1 : vector<8x128xf32> to vector<8x128xbf16>
    %cst = arith.constant dense<0.000000e+00> : vector<8x384xf32>
    %5 = tpu.matmul %4, %2, %cst {dimension_numbers = #tpu.dot_dimension_numbers<[1], [0], [0], [1], [0, 0, 1, 1], [], []>} : vector<8x128xbf16>, vector<128x384xbf16>, vector<8x384xf32> -> vector<8x384xf32>
    %6 = vector.broadcast %3 : vector<1x384xf32> to vector<8x384xf32>
    %7 = arith.addf %5, %6 : vector<8x384xf32>
    %8 = vector.extract_strided_slice %7 {offsets = [0, 0], sizes = [8, 128], strides = [1, 1]} : vector<8x384xf32> to vector<8x128xf32>
    %9 = vector.extract_strided_slice %7 {offsets = [0, 128], sizes = [8, 128], strides = [1, 1]} : vector<8x384xf32> to vector<8x128xf32>
    %10 = vector.extract_strided_slice %7 {offsets = [0, 256], sizes = [8, 128], strides = [1, 1]} : vector<8x384xf32> to vector<8x128xf32>
    %11 = arith.truncf %8 : vector<8x128xf32> to vector<8x128xbf16>
    %12 = arith.truncf %9 : vector<8x128xf32> to vector<8x128xbf16>
    %cst_6 = arith.constant dense<0.000000e+00> : vector<8x8xf32>
    %13 = tpu.matmul %11, %12, %cst_6 {dimension_numbers = #tpu.dot_dimension_numbers<[1], [1], [0], [0], [0, 0, 1, 0], [], []>} : vector<8x128xbf16>, vector<8x128xbf16>, vector<8x8xf32> -> vector<8x8xf32>
    %cst_7 = arith.constant 0.176776692 : f32
    %14 = vector.broadcast %cst_7 : f32 to vector<8x8xf32>
    %15 = arith.mulf %13, %14 : vector<8x8xf32>
    %cst_8 = arith.constant dense<0xFF800000> : vector<8xf32>
    %16 = vector.multi_reduction <maximumf>, %15, %cst_8 [1] : vector<8x8xf32> to vector<8xf32>
    %17 = vector.shape_cast %16 : vector<8xf32> to vector<8x1xf32>
    %18 = vector.broadcast %17 : vector<8x1xf32> to vector<8x8xf32>
    %19 = arith.subf %15, %18 : vector<8x8xf32>
    %20 = math.exp %19 : vector<8x8xf32>
    %cst_9 = arith.constant dense<0.000000e+00> : vector<8xf32>
    %21 = vector.multi_reduction <add>, %20, %cst_9 [1] : vector<8x8xf32> to vector<8xf32>
    %22 = vector.shape_cast %21 : vector<8xf32> to vector<8x1xf32>
    %23 = tpu.reciprocal %22 {approx = true} : vector<8x1xf32> -> vector<8x1xf32>
    %24 = vector.broadcast %23 : vector<8x1xf32> to vector<8x8xf32>
    %25 = arith.mulf %20, %24 : vector<8x8xf32>
    %26 = arith.truncf %25 : vector<8x8xf32> to vector<8x8xbf16>
    %27 = arith.truncf %10 : vector<8x128xf32> to vector<8x128xbf16>
    %cst_10 = arith.constant dense<0.000000e+00> : vector<8x128xf32>
    %28 = tpu.matmul %26, %27, %cst_10 {dimension_numbers = #tpu.dot_dimension_numbers<[1], [0], [0], [1], [0, 0, 1, 1], [], []>} : vector<8x8xbf16>, vector<8x128xbf16>, vector<8x128xf32> -> vector<8x128xf32>
    %c0_11 = arith.constant 0 : index
    %c0_12 = arith.constant 0 : index
    %29 = vector.load %arg4[%c0_11, %c0_12] : memref<128x128xbf16, #tpu.memory_space<vmem>>, vector<128x128xbf16>
    %c0_13 = arith.constant 0 : index
    %c0_14 = arith.constant 0 : index
    %30 = vector.load %arg5[%c0_13, %c0_14] : memref<1x128xf32, #tpu.memory_space<vmem>>, vector<1x128xf32>
    %31 = arith.truncf %28 : vector<8x128xf32> to vector<8x128xbf16>
    %cst_15 = arith.constant dense<0.000000e+00> : vector<8x128xf32>
    %32 = tpu.matmul %31, %29, %cst_15 {dimension_numbers = #tpu.dot_dimension_numbers<[1], [0], [0], [1], [0, 0, 1, 1], [], []>} : vector<8x128xbf16>, vector<128x128xbf16>, vector<8x128xf32> -> vector<8x128xf32>
    %33 = vector.broadcast %30 : vector<1x128xf32> to vector<8x128xf32>
    %34 = arith.addf %32, %33 : vector<8x128xf32>
    %c0_16 = arith.constant 0 : index
    %c0_17 = arith.constant 0 : index
    %35 = vector.load %arg6[%c0_16, %c0_17] : memref<1x128xf32, #tpu.memory_space<vmem>>, vector<1x128xf32>
    %c0_18 = arith.constant 0 : index
    %c0_19 = arith.constant 0 : index
    %36 = vector.load %arg7[%c0_18, %c0_19] : memref<1x128xf32, #tpu.memory_space<vmem>>, vector<1x128xf32>
    %37 = arith.addf %1, %34 : vector<8x128xf32>
    %cst_20 = arith.constant dense<0.000000e+00> : vector<8xf32>
    %38 = vector.multi_reduction <add>, %37, %cst_20 [1] : vector<8x128xf32> to vector<8xf32>
    %39 = vector.shape_cast %38 : vector<8xf32> to vector<8x1xf32>
    %cst_21 = arith.constant 3.125000e-02 : f32
    %40 = vector.broadcast %cst_21 : f32 to vector<8x1xf32>
    %41 = arith.mulf %39, %40 : vector<8x1xf32>
    %42 = arith.mulf %37, %37 : vector<8x128xf32>
    %cst_22 = arith.constant dense<0.000000e+00> : vector<8xf32>
    %43 = vector.multi_reduction <add>, %42, %cst_22 [1] : vector<8x128xf32> to vector<8xf32>
    %44 = vector.shape_cast %43 : vector<8xf32> to vector<8x1xf32>
    %cst_23 = arith.constant 3.125000e-02 : f32
    %45 = vector.broadcast %cst_23 : f32 to vector<8x1xf32>
    %46 = arith.mulf %44, %45 : vector<8x1xf32>
    %47 = arith.mulf %41, %41 : vector<8x1xf32>
    %48 = arith.subf %46, %47 : vector<8x1xf32>
    %cst_24 = arith.constant 0.000000e+00 : f32
    %49 = vector.broadcast %cst_24 : f32 to vector<8x1xf32>
    %50 = arith.maximumf %48, %49 : vector<8x1xf32>
    %51 = vector.broadcast %41 : vector<8x1xf32> to vector<8x128xf32>
    %52 = arith.subf %37, %51 : vector<8x128xf32>
    %cst_25 = arith.constant 9.99999974E-6 : f32
    %53 = vector.broadcast %cst_25 : f32 to vector<8x1xf32>
    %54 = arith.addf %50, %53 : vector<8x1xf32>
    %55 = math.rsqrt %54 : vector<8x1xf32>
    %56 = vector.broadcast %55 : vector<8x1xf32> to vector<8x128xf32>
    %57 = arith.mulf %52, %56 : vector<8x128xf32>
    %58 = vector.broadcast %35 : vector<1x128xf32> to vector<8x128xf32>
    %59 = arith.mulf %57, %58 : vector<8x128xf32>
    %60 = vector.broadcast %36 : vector<1x128xf32> to vector<8x128xf32>
    %61 = arith.addf %59, %60 : vector<8x128xf32>
    %c0_26 = arith.constant 0 : index
    %c0_27 = arith.constant 0 : index
    %62 = vector.load %arg8[%c0_26, %c0_27] : memref<128x128xbf16, #tpu.memory_space<vmem>>, vector<128x128xbf16>
    %c0_28 = arith.constant 0 : index
    %c0_29 = arith.constant 0 : index
    %63 = vector.load %arg9[%c0_28, %c0_29] : memref<1x128xf32, #tpu.memory_space<vmem>>, vector<1x128xf32>
    %64 = arith.truncf %61 : vector<8x128xf32> to vector<8x128xbf16>
    %cst_30 = arith.constant dense<0.000000e+00> : vector<8x128xf32>
    %65 = tpu.matmul %64, %62, %cst_30 {dimension_numbers = #tpu.dot_dimension_numbers<[1], [0], [0], [1], [0, 0, 1, 1], [], []>} : vector<8x128xbf16>, vector<128x128xbf16>, vector<8x128xf32> -> vector<8x128xf32>
    %66 = vector.broadcast %63 : vector<1x128xf32> to vector<8x128xf32>
    %67 = arith.addf %65, %66 : vector<8x128xf32>
    %cst_31 = arith.constant 0.000000e+00 : f32
    %68 = vector.broadcast %cst_31 : f32 to vector<8x128xf32>
    %69 = arith.maximumf %67, %68 : vector<8x128xf32>
    %c0_32 = arith.constant 0 : index
    %c0_33 = arith.constant 0 : index
    %70 = vector.load %arg10[%c0_32, %c0_33] : memref<128x128xbf16, #tpu.memory_space<vmem>>, vector<128x128xbf16>
    %c0_34 = arith.constant 0 : index
    %c0_35 = arith.constant 0 : index
    %71 = vector.load %arg11[%c0_34, %c0_35] : memref<1x128xf32, #tpu.memory_space<vmem>>, vector<1x128xf32>
    %72 = arith.truncf %69 : vector<8x128xf32> to vector<8x128xbf16>
    %cst_36 = arith.constant dense<0.000000e+00> : vector<8x128xf32>
    %73 = tpu.matmul %72, %70, %cst_36 {dimension_numbers = #tpu.dot_dimension_numbers<[1], [0], [0], [1], [0, 0, 1, 1], [], []>} : vector<8x128xbf16>, vector<128x128xbf16>, vector<8x128xf32> -> vector<8x128xf32>
    %74 = vector.broadcast %71 : vector<1x128xf32> to vector<8x128xf32>
    %75 = arith.addf %73, %74 : vector<8x128xf32>
    %c0_37 = arith.constant 0 : index
    %c0_38 = arith.constant 0 : index
    %76 = vector.load %arg12[%c0_37, %c0_38] : memref<1x128xf32, #tpu.memory_space<vmem>>, vector<1x128xf32>
    %c0_39 = arith.constant 0 : index
    %c0_40 = arith.constant 0 : index
    %77 = vector.load %arg13[%c0_39, %c0_40] : memref<1x128xf32, #tpu.memory_space<vmem>>, vector<1x128xf32>
    %78 = arith.addf %61, %75 : vector<8x128xf32>
    %cst_41 = arith.constant dense<0.000000e+00> : vector<8xf32>
    %79 = vector.multi_reduction <add>, %78, %cst_41 [1] : vector<8x128xf32> to vector<8xf32>
    %80 = vector.shape_cast %79 : vector<8xf32> to vector<8x1xf32>
    %cst_42 = arith.constant 3.125000e-02 : f32
    %81 = vector.broadcast %cst_42 : f32 to vector<8x1xf32>
    %82 = arith.mulf %80, %81 : vector<8x1xf32>
    %83 = arith.mulf %78, %78 : vector<8x128xf32>
    %cst_43 = arith.constant dense<0.000000e+00> : vector<8xf32>
    %84 = vector.multi_reduction <add>, %83, %cst_43 [1] : vector<8x128xf32> to vector<8xf32>
    %85 = vector.shape_cast %84 : vector<8xf32> to vector<8x1xf32>
    %cst_44 = arith.constant 3.125000e-02 : f32
    %86 = vector.broadcast %cst_44 : f32 to vector<8x1xf32>
    %87 = arith.mulf %85, %86 : vector<8x1xf32>
    %88 = arith.mulf %82, %82 : vector<8x1xf32>
    %89 = arith.subf %87, %88 : vector<8x1xf32>
    %cst_45 = arith.constant 0.000000e+00 : f32
    %90 = vector.broadcast %cst_45 : f32 to vector<8x1xf32>
    %91 = arith.maximumf %89, %90 : vector<8x1xf32>
    %92 = vector.broadcast %82 : vector<8x1xf32> to vector<8x128xf32>
    %93 = arith.subf %78, %92 : vector<8x128xf32>
    %cst_46 = arith.constant 9.99999974E-6 : f32
    %94 = vector.broadcast %cst_46 : f32 to vector<8x1xf32>
    %95 = arith.addf %91, %94 : vector<8x1xf32>
    %96 = math.rsqrt %95 : vector<8x1xf32>
    %97 = vector.broadcast %96 : vector<8x1xf32> to vector<8x128xf32>
    %98 = arith.mulf %93, %97 : vector<8x128xf32>
    %99 = vector.broadcast %76 : vector<1x128xf32> to vector<8x128xf32>
    %100 = arith.mulf %98, %99 : vector<8x128xf32>
    %101 = vector.broadcast %77 : vector<1x128xf32> to vector<8x128xf32>
    %102 = arith.addf %100, %101 : vector<8x128xf32>
    %c0_47 = arith.constant 0 : index
    %c0_48 = arith.constant 0 : index
    %c0_49 = arith.constant 0 : index
    %103 = vector.load %arg14[%c0_47, %c0_48, %c0_49] : memref<1x8x128xf32, #tpu.memory_space<vmem>>, vector<1x8x128xf32>
    %104 = vector.shape_cast %103 : vector<1x8x128xf32> to vector<8x128xf32>
    %105 = vector.shape_cast %102 : vector<8x128xf32> to vector<1x8x128xf32>
    tpu.vector_store %arg14[%c0_47, %c0_48, %c0_49], %105 {strides = array<i32>} : memref<1x8x128xf32, #tpu.memory_space<vmem>>, vector<1x8x128xf32>,
    return
  }
  func.func @transform_0(%arg0: i32) -> (i32, i32, i32) {
    %c0_i32 = arith.constant 0 : i32
    %c0_i32_0 = arith.constant 0 : i32
    %c0_i32_1 = arith.constant 0 : i32
    return %arg0, %c0_i32, %c0_i32_0 : i32, i32, i32
  }
  func.func @transform_1(%arg0: i32) -> (i32, i32) {
    %c0_i32 = arith.constant 0 : i32
    %c0_i32_0 = arith.constant 0 : i32
    %c0_i32_1 = arith.constant 0 : i32
    return %c0_i32, %c0_i32_0 : i32, i32
  }
  func.func @transform_2(%arg0: i32) -> (i32, i32) {
    %c0_i32 = arith.constant 0 : i32
    %c0_i32_0 = arith.constant 0 : i32
    %c0_i32_1 = arith.constant 0 : i32
    return %c0_i32, %c0_i32_0 : i32, i32
  }
  func.func @transform_3(%arg0: i32) -> (i32, i32) {
    %c0_i32 = arith.constant 0 : i32
    %c0_i32_0 = arith.constant 0 : i32
    %c0_i32_1 = arith.constant 0 : i32
    return %c0_i32, %c0_i32_0 : i32, i32
  }
  func.func @transform_4(%arg0: i32) -> (i32, i32) {
    %c0_i32 = arith.constant 0 : i32
    %c0_i32_0 = arith.constant 0 : i32
    %c0_i32_1 = arith.constant 0 : i32
    return %c0_i32, %c0_i32_0 : i32, i32
  }
  func.func @transform_5(%arg0: i32) -> (i32, i32) {
    %c0_i32 = arith.constant 0 : i32
    %c0_i32_0 = arith.constant 0 : i32
    %c0_i32_1 = arith.constant 0 : i32
    return %c0_i32, %c0_i32_0 : i32, i32
  }
  func.func @transform_6(%arg0: i32) -> (i32, i32) {
    %c0_i32 = arith.constant 0 : i32
    %c0_i32_0 = arith.constant 0 : i32
    %c0_i32_1 = arith.constant 0 : i32
    return %c0_i32, %c0_i32_0 : i32, i32
  }
  func.func @transform_7(%arg0: i32) -> (i32, i32) {
    %c0_i32 = arith.constant 0 : i32
    %c0_i32_0 = arith.constant 0 : i32
    %c0_i32_1 = arith.constant 0 : i32
    return %c0_i32, %c0_i32_0 : i32, i32
  }
  func.func @transform_8(%arg0: i32) -> (i32, i32) {
    %c0_i32 = arith.constant 0 : i32
    %c0_i32_0 = arith.constant 0 : i32
    %c0_i32_1 = arith.constant 0 : i32
    return %c0_i32, %c0_i32_0 : i32, i32
  }
  func.func @transform_9(%arg0: i32) -> (i32, i32) {
    %c0_i32 = arith.constant 0 : i32
    %c0_i32_0 = arith.constant 0 : i32
    %c0_i32_1 = arith.constant 0 : i32
    return %c0_i32, %c0_i32_0 : i32, i32
  }
  func.func @transform_10(%arg0: i32) -> (i32, i32) {
    %c0_i32 = arith.constant 0 : i32
    %c0_i32_0 = arith.constant 0 : i32
    %c0_i32_1 = arith.constant 0 : i32
    return %c0_i32, %c0_i32_0 : i32, i32
  }
  func.func @transform_11(%arg0: i32) -> (i32, i32) {
    %c0_i32 = arith.constant 0 : i32
    %c0_i32_0 = arith.constant 0 : i32
    %c0_i32_1 = arith.constant 0 : i32
    return %c0_i32, %c0_i32_0 : i32, i32
  }
  func.func @transform_12(%arg0: i32) -> (i32, i32) {
    %c0_i32 = arith.constant 0 : i32
    %c0_i32_0 = arith.constant 0 : i32
    %c0_i32_1 = arith.constant 0 : i32
    return %c0_i32, %c0_i32_0 : i32, i32
  }
  func.func @transform_13(%arg0: i32) -> (i32, i32, i32) {
    %c0_i32 = arith.constant 0 : i32
    %c0_i32_0 = arith.constant 0 : i32
    %c0_i32_1 = arith.constant 0 : i32
    return %arg0, %c0_i32, %c0_i32_0 : i32, i32, i32
  }
}

module attributes {stable_mosaic.version = 11 : i64} {
  func.func @_logits_kernel(%arg0: i32, %arg1: memref<1x8x128xf32, #tpu.memory_space<vmem>>, %arg2: memref<128x128xbf16, #tpu.memory_space<vmem>>, %arg3: memref<1x128xf32, #tpu.memory_space<vmem>>, %arg4: memref<1x8x128xf32, #tpu.memory_space<vmem>>) attributes {dimension_semantics = [#tpu.dimension_semantics<parallel>], iteration_bounds = array<i64: 2>, scalar_prefetch = 0 : i64, scratch_operands = 0 : i64, tpu.core_type = #tpu.core_type<tc>, window_params = [{transform_indices = @transform_0, window_bounds = array<i64: 1, 8, 128>}, {pipeline_mode = #tpu.pipeline_mode<synchronous>, transform_indices = @transform_1, window_bounds = array<i64: 128, 128>}, {pipeline_mode = #tpu.pipeline_mode<synchronous>, transform_indices = @transform_2, window_bounds = array<i64: 1, 128>}, {transform_indices = @transform_3, window_bounds = array<i64: 1, 8, 128>}]} {
    %c0 = arith.constant 0 : index
    %c0_0 = arith.constant 0 : index
    %c0_1 = arith.constant 0 : index
    %0 = vector.load %arg1[%c0, %c0_0, %c0_1] : memref<1x8x128xf32, #tpu.memory_space<vmem>>, vector<1x8x128xf32>
    %1 = vector.shape_cast %0 : vector<1x8x128xf32> to vector<8x128xf32>
    %c0_2 = arith.constant 0 : index
    %c0_3 = arith.constant 0 : index
    %2 = vector.load %arg2[%c0_2, %c0_3] : memref<128x128xbf16, #tpu.memory_space<vmem>>, vector<128x128xbf16>
    %c0_4 = arith.constant 0 : index
    %c0_5 = arith.constant 0 : index
    %3 = vector.load %arg3[%c0_4, %c0_5] : memref<1x128xf32, #tpu.memory_space<vmem>>, vector<1x128xf32>
    %4 = arith.truncf %1 : vector<8x128xf32> to vector<8x128xbf16>
    %cst = arith.constant dense<0.000000e+00> : vector<8x128xf32>
    %5 = tpu.matmul %4, %2, %cst {dimension_numbers = #tpu.dot_dimension_numbers<[1], [0], [0], [1], [0, 0, 1, 1], [], []>} : vector<8x128xbf16>, vector<128x128xbf16>, vector<8x128xf32> -> vector<8x128xf32>
    %6 = vector.broadcast %3 : vector<1x128xf32> to vector<8x128xf32>
    %7 = arith.addf %5, %6 : vector<8x128xf32>
    %c0_6 = arith.constant 0 : index
    %c0_7 = arith.constant 0 : index
    %c0_8 = arith.constant 0 : index
    %8 = vector.load %arg4[%c0_6, %c0_7, %c0_8] : memref<1x8x128xf32, #tpu.memory_space<vmem>>, vector<1x8x128xf32>
    %9 = vector.shape_cast %8 : vector<1x8x128xf32> to vector<8x128xf32>
    %10 = vector.shape_cast %7 : vector<8x128xf32> to vector<1x8x128xf32>
    tpu.vector_store %arg4[%c0_6, %c0_7, %c0_8], %10 {strides = array<i32>} : memref<1x8x128xf32, #tpu.memory_space<vmem>>, vector<1x8x128xf32>,
    return
  }
  func.func @transform_0(%arg0: i32) -> (i32, i32, i32) {
    %c0_i32 = arith.constant 0 : i32
    %c0_i32_0 = arith.constant 0 : i32
    %c0_i32_1 = arith.constant 0 : i32
    return %arg0, %c0_i32, %c0_i32_0 : i32, i32, i32
  }
  func.func @transform_1(%arg0: i32) -> (i32, i32) {
    %c0_i32 = arith.constant 0 : i32
    %c0_i32_0 = arith.constant 0 : i32
    %c0_i32_1 = arith.constant 0 : i32
    return %c0_i32, %c0_i32_0 : i32, i32
  }
  func.func @transform_2(%arg0: i32) -> (i32, i32) {
    %c0_i32 = arith.constant 0 : i32
    %c0_i32_0 = arith.constant 0 : i32
    %c0_i32_1 = arith.constant 0 : i32
    return %c0_i32, %c0_i32_0 : i32, i32
  }
  func.func @transform_3(%arg0: i32) -> (i32, i32, i32) {
    %c0_i32 = arith.constant 0 : i32
    %c0_i32_0 = arith.constant 0 : i32
    %c0_i32_1 = arith.constant 0 : i32
    return %arg0, %c0_i32, %c0_i32_0 : i32, i32, i32
  }
}

module attributes {stable_mosaic.version = 11 : i64} {
  func.func @_decoder_layer_kernel(%arg0: i32, %arg1: memref<1x8x128xf32, #tpu.memory_space<vmem>>, %arg2: memref<1x8x128xf32, #tpu.memory_space<vmem>>, %arg3: memref<128x384xbf16, #tpu.memory_space<vmem>>, %arg4: memref<1x384xf32, #tpu.memory_space<vmem>>, %arg5: memref<128x128xbf16, #tpu.memory_space<vmem>>, %arg6: memref<1x128xf32, #tpu.memory_space<vmem>>, %arg7: memref<1x128xf32, #tpu.memory_space<vmem>>, %arg8: memref<1x128xf32, #tpu.memory_space<vmem>>, %arg9: memref<128x128xbf16, #tpu.memory_space<vmem>>, %arg10: memref<1x128xf32, #tpu.memory_space<vmem>>, %arg11: memref<128x256xbf16, #tpu.memory_space<vmem>>, %arg12: memref<1x256xf32, #tpu.memory_space<vmem>>, %arg13: memref<128x128xbf16, #tpu.memory_space<vmem>>, %arg14: memref<1x128xf32, #tpu.memory_space<vmem>>, %arg15: memref<1x128xf32, #tpu.memory_space<vmem>>, %arg16: memref<1x128xf32, #tpu.memory_space<vmem>>, %arg17: memref<128x128xbf16, #tpu.memory_space<vmem>>, %arg18: memref<1x128xf32, #tpu.memory_space<vmem>>, %arg19: memref<128x128xbf16, #tpu.memory_space<vmem>>, %arg20: memref<1x128xf32, #tpu.memory_space<vmem>>, %arg21: memref<1x128xf32, #tpu.memory_space<vmem>>, %arg22: memref<1x128xf32, #tpu.memory_space<vmem>>, %arg23: memref<1x8x128xf32, #tpu.memory_space<vmem>>) attributes {dimension_semantics = [#tpu.dimension_semantics<parallel>], iteration_bounds = array<i64: 2>, scalar_prefetch = 0 : i64, scratch_operands = 0 : i64, tpu.core_type = #tpu.core_type<tc>, window_params = [{transform_indices = @transform_0, window_bounds = array<i64: 1, 8, 128>}, {transform_indices = @transform_1, window_bounds = array<i64: 1, 8, 128>}, {pipeline_mode = #tpu.pipeline_mode<synchronous>, transform_indices = @transform_2, window_bounds = array<i64: 128, 384>}, {pipeline_mode = #tpu.pipeline_mode<synchronous>, transform_indices = @transform_3, window_bounds = array<i64: 1, 384>}, {pipeline_mode = #tpu.pipeline_mode<synchronous>, transform_indices = @transform_4, window_bounds = array<i64: 128, 128>}, {pipeline_mode = #tpu.pipeline_mode<synchronous>, transform_indices = @transform_5, window_bounds = array<i64: 1, 128>}, {pipeline_mode = #tpu.pipeline_mode<synchronous>, transform_indices = @transform_6, window_bounds = array<i64: 1, 128>}, {pipeline_mode = #tpu.pipeline_mode<synchronous>, transform_indices = @transform_7, window_bounds = array<i64: 1, 128>}, {pipeline_mode = #tpu.pipeline_mode<synchronous>, transform_indices = @transform_8, window_bounds = array<i64: 128, 128>}, {pipeline_mode = #tpu.pipeline_mode<synchronous>, transform_indices = @transform_9, window_bounds = array<i64: 1, 128>}, {pipeline_mode = #tpu.pipeline_mode<synchronous>, transform_indices = @transform_10, window_bounds = array<i64: 128, 256>}, {pipeline_mode = #tpu.pipeline_mode<synchronous>, transform_indices = @transform_11, window_bounds = array<i64: 1, 256>}, {pipeline_mode = #tpu.pipeline_mode<synchronous>, transform_indices = @transform_12, window_bounds = array<i64: 128, 128>}, {pipeline_mode = #tpu.pipeline_mode<synchronous>, transform_indices = @transform_13, window_bounds = array<i64: 1, 128>}, {pipeline_mode = #tpu.pipeline_mode<synchronous>, transform_indices = @transform_14, window_bounds = array<i64: 1, 128>}, {pipeline_mode = #tpu.pipeline_mode<synchronous>, transform_indices = @transform_15, window_bounds = array<i64: 1, 128>}, {pipeline_mode = #tpu.pipeline_mode<synchronous>, transform_indices = @transform_16, window_bounds = array<i64: 128, 128>}, {pipeline_mode = #tpu.pipeline_mode<synchronous>, transform_indices = @transform_17, window_bounds = array<i64: 1, 128>}, {pipeline_mode = #tpu.pipeline_mode<synchronous>, transform_indices = @transform_18, window_bounds = array<i64: 128, 128>}, {pipeline_mode = #tpu.pipeline_mode<synchronous>, transform_indices = @transform_19, window_bounds = array<i64: 1, 128>}, {pipeline_mode = #tpu.pipeline_mode<synchronous>, transform_indices = @transform_20, window_bounds = array<i64: 1, 128>}, {pipeline_mode = #tpu.pipeline_mode<synchronous>, transform_indices = @transform_21, window_bounds = array<i64: 1, 128>}, {transform_indices = @transform_22, window_bounds = array<i64: 1, 8, 128>}]} {
    %c0 = arith.constant 0 : index
    %c0_0 = arith.constant 0 : index
    %c0_1 = arith.constant 0 : index
    %0 = vector.load %arg1[%c0, %c0_0, %c0_1] : memref<1x8x128xf32, #tpu.memory_space<vmem>>, vector<1x8x128xf32>
    %1 = vector.shape_cast %0 : vector<1x8x128xf32> to vector<8x128xf32>
    %c0_2 = arith.constant 0 : index
    %c0_3 = arith.constant 0 : index
    %c0_4 = arith.constant 0 : index
    %2 = vector.load %arg2[%c0_2, %c0_3, %c0_4] : memref<1x8x128xf32, #tpu.memory_space<vmem>>, vector<1x8x128xf32>
    %3 = vector.shape_cast %2 : vector<1x8x128xf32> to vector<8x128xf32>
    %c0_5 = arith.constant 0 : index
    %c0_6 = arith.constant 0 : index
    %4 = vector.load %arg3[%c0_5, %c0_6] : memref<128x384xbf16, #tpu.memory_space<vmem>>, vector<128x384xbf16>
    %c0_7 = arith.constant 0 : index
    %c0_8 = arith.constant 0 : index
    %5 = vector.load %arg4[%c0_7, %c0_8] : memref<1x384xf32, #tpu.memory_space<vmem>>, vector<1x384xf32>
    %6 = arith.truncf %1 : vector<8x128xf32> to vector<8x128xbf16>
    %cst = arith.constant dense<0.000000e+00> : vector<8x384xf32>
    %7 = tpu.matmul %6, %4, %cst {dimension_numbers = #tpu.dot_dimension_numbers<[1], [0], [0], [1], [0, 0, 1, 1], [], []>} : vector<8x128xbf16>, vector<128x384xbf16>, vector<8x384xf32> -> vector<8x384xf32>
    %8 = vector.broadcast %5 : vector<1x384xf32> to vector<8x384xf32>
    %9 = arith.addf %7, %8 : vector<8x384xf32>
    %10 = vector.extract_strided_slice %9 {offsets = [0, 0], sizes = [8, 128], strides = [1, 1]} : vector<8x384xf32> to vector<8x128xf32>
    %11 = vector.extract_strided_slice %9 {offsets = [0, 128], sizes = [8, 128], strides = [1, 1]} : vector<8x384xf32> to vector<8x128xf32>
    %12 = vector.extract_strided_slice %9 {offsets = [0, 256], sizes = [8, 128], strides = [1, 1]} : vector<8x384xf32> to vector<8x128xf32>
    %13 = arith.truncf %10 : vector<8x128xf32> to vector<8x128xbf16>
    %14 = arith.truncf %11 : vector<8x128xf32> to vector<8x128xbf16>
    %cst_9 = arith.constant dense<0.000000e+00> : vector<8x8xf32>
    %15 = tpu.matmul %13, %14, %cst_9 {dimension_numbers = #tpu.dot_dimension_numbers<[1], [1], [0], [0], [0, 0, 1, 0], [], []>} : vector<8x128xbf16>, vector<8x128xbf16>, vector<8x8xf32> -> vector<8x8xf32>
    %cst_10 = arith.constant 0.176776692 : f32
    %16 = vector.broadcast %cst_10 : f32 to vector<8x8xf32>
    %17 = arith.mulf %15, %16 : vector<8x8xf32>
    %18 = tpu.iota {dimensions = array<i32: 0>} : vector<8x8xi32>
    %19 = tpu.iota {dimensions = array<i32: 1>} : vector<8x8xi32>
    %20 = arith.cmpi sge, %18, %19 : vector<8x8xi32>
    %cst_11 = arith.constant -1.000000e+30 : f32
    %21 = vector.broadcast %cst_11 : f32 to vector<8x8xf32>
    %22 = arith.select %20, %17, %21 : vector<8x8xi1>, vector<8x8xf32>
    %cst_12 = arith.constant dense<0xFF800000> : vector<8xf32>
    %23 = vector.multi_reduction <maximumf>, %22, %cst_12 [1] : vector<8x8xf32> to vector<8xf32>
    %24 = vector.shape_cast %23 : vector<8xf32> to vector<8x1xf32>
    %25 = vector.broadcast %24 : vector<8x1xf32> to vector<8x8xf32>
    %26 = arith.subf %22, %25 : vector<8x8xf32>
    %27 = math.exp %26 : vector<8x8xf32>
    %cst_13 = arith.constant dense<0.000000e+00> : vector<8xf32>
    %28 = vector.multi_reduction <add>, %27, %cst_13 [1] : vector<8x8xf32> to vector<8xf32>
    %29 = vector.shape_cast %28 : vector<8xf32> to vector<8x1xf32>
    %30 = tpu.reciprocal %29 {approx = true} : vector<8x1xf32> -> vector<8x1xf32>
    %31 = vector.broadcast %30 : vector<8x1xf32> to vector<8x8xf32>
    %32 = arith.mulf %27, %31 : vector<8x8xf32>
    %33 = arith.truncf %32 : vector<8x8xf32> to vector<8x8xbf16>
    %34 = arith.truncf %12 : vector<8x128xf32> to vector<8x128xbf16>
    %cst_14 = arith.constant dense<0.000000e+00> : vector<8x128xf32>
    %35 = tpu.matmul %33, %34, %cst_14 {dimension_numbers = #tpu.dot_dimension_numbers<[1], [0], [0], [1], [0, 0, 1, 1], [], []>} : vector<8x8xbf16>, vector<8x128xbf16>, vector<8x128xf32> -> vector<8x128xf32>
    %c0_15 = arith.constant 0 : index
    %c0_16 = arith.constant 0 : index
    %36 = vector.load %arg5[%c0_15, %c0_16] : memref<128x128xbf16, #tpu.memory_space<vmem>>, vector<128x128xbf16>
    %c0_17 = arith.constant 0 : index
    %c0_18 = arith.constant 0 : index
    %37 = vector.load %arg6[%c0_17, %c0_18] : memref<1x128xf32, #tpu.memory_space<vmem>>, vector<1x128xf32>
    %38 = arith.truncf %35 : vector<8x128xf32> to vector<8x128xbf16>
    %cst_19 = arith.constant dense<0.000000e+00> : vector<8x128xf32>
    %39 = tpu.matmul %38, %36, %cst_19 {dimension_numbers = #tpu.dot_dimension_numbers<[1], [0], [0], [1], [0, 0, 1, 1], [], []>} : vector<8x128xbf16>, vector<128x128xbf16>, vector<8x128xf32> -> vector<8x128xf32>
    %40 = vector.broadcast %37 : vector<1x128xf32> to vector<8x128xf32>
    %41 = arith.addf %39, %40 : vector<8x128xf32>
    %c0_20 = arith.constant 0 : index
    %c0_21 = arith.constant 0 : index
    %42 = vector.load %arg7[%c0_20, %c0_21] : memref<1x128xf32, #tpu.memory_space<vmem>>, vector<1x128xf32>
    %c0_22 = arith.constant 0 : index
    %c0_23 = arith.constant 0 : index
    %43 = vector.load %arg8[%c0_22, %c0_23] : memref<1x128xf32, #tpu.memory_space<vmem>>, vector<1x128xf32>
    %44 = arith.addf %1, %41 : vector<8x128xf32>
    %cst_24 = arith.constant dense<0.000000e+00> : vector<8xf32>
    %45 = vector.multi_reduction <add>, %44, %cst_24 [1] : vector<8x128xf32> to vector<8xf32>
    %46 = vector.shape_cast %45 : vector<8xf32> to vector<8x1xf32>
    %cst_25 = arith.constant 3.125000e-02 : f32
    %47 = vector.broadcast %cst_25 : f32 to vector<8x1xf32>
    %48 = arith.mulf %46, %47 : vector<8x1xf32>
    %49 = arith.mulf %44, %44 : vector<8x128xf32>
    %cst_26 = arith.constant dense<0.000000e+00> : vector<8xf32>
    %50 = vector.multi_reduction <add>, %49, %cst_26 [1] : vector<8x128xf32> to vector<8xf32>
    %51 = vector.shape_cast %50 : vector<8xf32> to vector<8x1xf32>
    %cst_27 = arith.constant 3.125000e-02 : f32
    %52 = vector.broadcast %cst_27 : f32 to vector<8x1xf32>
    %53 = arith.mulf %51, %52 : vector<8x1xf32>
    %54 = arith.mulf %48, %48 : vector<8x1xf32>
    %55 = arith.subf %53, %54 : vector<8x1xf32>
    %cst_28 = arith.constant 0.000000e+00 : f32
    %56 = vector.broadcast %cst_28 : f32 to vector<8x1xf32>
    %57 = arith.maximumf %55, %56 : vector<8x1xf32>
    %58 = vector.broadcast %48 : vector<8x1xf32> to vector<8x128xf32>
    %59 = arith.subf %44, %58 : vector<8x128xf32>
    %cst_29 = arith.constant 9.99999974E-6 : f32
    %60 = vector.broadcast %cst_29 : f32 to vector<8x1xf32>
    %61 = arith.addf %57, %60 : vector<8x1xf32>
    %62 = math.rsqrt %61 : vector<8x1xf32>
    %63 = vector.broadcast %62 : vector<8x1xf32> to vector<8x128xf32>
    %64 = arith.mulf %59, %63 : vector<8x128xf32>
    %65 = vector.broadcast %42 : vector<1x128xf32> to vector<8x128xf32>
    %66 = arith.mulf %64, %65 : vector<8x128xf32>
    %67 = vector.broadcast %43 : vector<1x128xf32> to vector<8x128xf32>
    %68 = arith.addf %66, %67 : vector<8x128xf32>
    %c0_30 = arith.constant 0 : index
    %c0_31 = arith.constant 0 : index
    %69 = vector.load %arg9[%c0_30, %c0_31] : memref<128x128xbf16, #tpu.memory_space<vmem>>, vector<128x128xbf16>
    %c0_32 = arith.constant 0 : index
    %c0_33 = arith.constant 0 : index
    %70 = vector.load %arg10[%c0_32, %c0_33] : memref<1x128xf32, #tpu.memory_space<vmem>>, vector<1x128xf32>
    %71 = arith.truncf %68 : vector<8x128xf32> to vector<8x128xbf16>
    %cst_34 = arith.constant dense<0.000000e+00> : vector<8x128xf32>
    %72 = tpu.matmul %71, %69, %cst_34 {dimension_numbers = #tpu.dot_dimension_numbers<[1], [0], [0], [1], [0, 0, 1, 1], [], []>} : vector<8x128xbf16>, vector<128x128xbf16>, vector<8x128xf32> -> vector<8x128xf32>
    %73 = vector.broadcast %70 : vector<1x128xf32> to vector<8x128xf32>
    %74 = arith.addf %72, %73 : vector<8x128xf32>
    %c0_35 = arith.constant 0 : index
    %c0_36 = arith.constant 0 : index
    %75 = vector.load %arg11[%c0_35, %c0_36] : memref<128x256xbf16, #tpu.memory_space<vmem>>, vector<128x256xbf16>
    %c0_37 = arith.constant 0 : index
    %c0_38 = arith.constant 0 : index
    %76 = vector.load %arg12[%c0_37, %c0_38] : memref<1x256xf32, #tpu.memory_space<vmem>>, vector<1x256xf32>
    %77 = arith.truncf %3 : vector<8x128xf32> to vector<8x128xbf16>
    %cst_39 = arith.constant dense<0.000000e+00> : vector<8x256xf32>
    %78 = tpu.matmul %77, %75, %cst_39 {dimension_numbers = #tpu.dot_dimension_numbers<[1], [0], [0], [1], [0, 0, 1, 1], [], []>} : vector<8x128xbf16>, vector<128x256xbf16>, vector<8x256xf32> -> vector<8x256xf32>
    %79 = vector.broadcast %76 : vector<1x256xf32> to vector<8x256xf32>
    %80 = arith.addf %78, %79 : vector<8x256xf32>
    %81 = vector.extract_strided_slice %80 {offsets = [0, 0], sizes = [8, 128], strides = [1, 1]} : vector<8x256xf32> to vector<8x128xf32>
    %82 = vector.extract_strided_slice %80 {offsets = [0, 128], sizes = [8, 128], strides = [1, 1]} : vector<8x256xf32> to vector<8x128xf32>
    %83 = arith.truncf %74 : vector<8x128xf32> to vector<8x128xbf16>
    %84 = arith.truncf %81 : vector<8x128xf32> to vector<8x128xbf16>
    %cst_40 = arith.constant dense<0.000000e+00> : vector<8x8xf32>
    %85 = tpu.matmul %83, %84, %cst_40 {dimension_numbers = #tpu.dot_dimension_numbers<[1], [1], [0], [0], [0, 0, 1, 0], [], []>} : vector<8x128xbf16>, vector<8x128xbf16>, vector<8x8xf32> -> vector<8x8xf32>
    %cst_41 = arith.constant 0.176776692 : f32
    %86 = vector.broadcast %cst_41 : f32 to vector<8x8xf32>
    %87 = arith.mulf %85, %86 : vector<8x8xf32>
    %cst_42 = arith.constant dense<0xFF800000> : vector<8xf32>
    %88 = vector.multi_reduction <maximumf>, %87, %cst_42 [1] : vector<8x8xf32> to vector<8xf32>
    %89 = vector.shape_cast %88 : vector<8xf32> to vector<8x1xf32>
    %90 = vector.broadcast %89 : vector<8x1xf32> to vector<8x8xf32>
    %91 = arith.subf %87, %90 : vector<8x8xf32>
    %92 = math.exp %91 : vector<8x8xf32>
    %cst_43 = arith.constant dense<0.000000e+00> : vector<8xf32>
    %93 = vector.multi_reduction <add>, %92, %cst_43 [1] : vector<8x8xf32> to vector<8xf32>
    %94 = vector.shape_cast %93 : vector<8xf32> to vector<8x1xf32>
    %95 = tpu.reciprocal %94 {approx = true} : vector<8x1xf32> -> vector<8x1xf32>
    %96 = vector.broadcast %95 : vector<8x1xf32> to vector<8x8xf32>
    %97 = arith.mulf %92, %96 : vector<8x8xf32>
    %98 = arith.truncf %97 : vector<8x8xf32> to vector<8x8xbf16>
    %99 = arith.truncf %82 : vector<8x128xf32> to vector<8x128xbf16>
    %cst_44 = arith.constant dense<0.000000e+00> : vector<8x128xf32>
    %100 = tpu.matmul %98, %99, %cst_44 {dimension_numbers = #tpu.dot_dimension_numbers<[1], [0], [0], [1], [0, 0, 1, 1], [], []>} : vector<8x8xbf16>, vector<8x128xbf16>, vector<8x128xf32> -> vector<8x128xf32>
    %c0_45 = arith.constant 0 : index
    %c0_46 = arith.constant 0 : index
    %101 = vector.load %arg13[%c0_45, %c0_46] : memref<128x128xbf16, #tpu.memory_space<vmem>>, vector<128x128xbf16>
    %c0_47 = arith.constant 0 : index
    %c0_48 = arith.constant 0 : index
    %102 = vector.load %arg14[%c0_47, %c0_48] : memref<1x128xf32, #tpu.memory_space<vmem>>, vector<1x128xf32>
    %103 = arith.truncf %100 : vector<8x128xf32> to vector<8x128xbf16>
    %cst_49 = arith.constant dense<0.000000e+00> : vector<8x128xf32>
    %104 = tpu.matmul %103, %101, %cst_49 {dimension_numbers = #tpu.dot_dimension_numbers<[1], [0], [0], [1], [0, 0, 1, 1], [], []>} : vector<8x128xbf16>, vector<128x128xbf16>, vector<8x128xf32> -> vector<8x128xf32>
    %105 = vector.broadcast %102 : vector<1x128xf32> to vector<8x128xf32>
    %106 = arith.addf %104, %105 : vector<8x128xf32>
    %c0_50 = arith.constant 0 : index
    %c0_51 = arith.constant 0 : index
    %107 = vector.load %arg15[%c0_50, %c0_51] : memref<1x128xf32, #tpu.memory_space<vmem>>, vector<1x128xf32>
    %c0_52 = arith.constant 0 : index
    %c0_53 = arith.constant 0 : index
    %108 = vector.load %arg16[%c0_52, %c0_53] : memref<1x128xf32, #tpu.memory_space<vmem>>, vector<1x128xf32>
    %109 = arith.addf %68, %106 : vector<8x128xf32>
    %cst_54 = arith.constant dense<0.000000e+00> : vector<8xf32>
    %110 = vector.multi_reduction <add>, %109, %cst_54 [1] : vector<8x128xf32> to vector<8xf32>
    %111 = vector.shape_cast %110 : vector<8xf32> to vector<8x1xf32>
    %cst_55 = arith.constant 3.125000e-02 : f32
    %112 = vector.broadcast %cst_55 : f32 to vector<8x1xf32>
    %113 = arith.mulf %111, %112 : vector<8x1xf32>
    %114 = arith.mulf %109, %109 : vector<8x128xf32>
    %cst_56 = arith.constant dense<0.000000e+00> : vector<8xf32>
    %115 = vector.multi_reduction <add>, %114, %cst_56 [1] : vector<8x128xf32> to vector<8xf32>
    %116 = vector.shape_cast %115 : vector<8xf32> to vector<8x1xf32>
    %cst_57 = arith.constant 3.125000e-02 : f32
    %117 = vector.broadcast %cst_57 : f32 to vector<8x1xf32>
    %118 = arith.mulf %116, %117 : vector<8x1xf32>
    %119 = arith.mulf %113, %113 : vector<8x1xf32>
    %120 = arith.subf %118, %119 : vector<8x1xf32>
    %cst_58 = arith.constant 0.000000e+00 : f32
    %121 = vector.broadcast %cst_58 : f32 to vector<8x1xf32>
    %122 = arith.maximumf %120, %121 : vector<8x1xf32>
    %123 = vector.broadcast %113 : vector<8x1xf32> to vector<8x128xf32>
    %124 = arith.subf %109, %123 : vector<8x128xf32>
    %cst_59 = arith.constant 9.99999974E-6 : f32
    %125 = vector.broadcast %cst_59 : f32 to vector<8x1xf32>
    %126 = arith.addf %122, %125 : vector<8x1xf32>
    %127 = math.rsqrt %126 : vector<8x1xf32>
    %128 = vector.broadcast %127 : vector<8x1xf32> to vector<8x128xf32>
    %129 = arith.mulf %124, %128 : vector<8x128xf32>
    %130 = vector.broadcast %107 : vector<1x128xf32> to vector<8x128xf32>
    %131 = arith.mulf %129, %130 : vector<8x128xf32>
    %132 = vector.broadcast %108 : vector<1x128xf32> to vector<8x128xf32>
    %133 = arith.addf %131, %132 : vector<8x128xf32>
    %c0_60 = arith.constant 0 : index
    %c0_61 = arith.constant 0 : index
    %134 = vector.load %arg17[%c0_60, %c0_61] : memref<128x128xbf16, #tpu.memory_space<vmem>>, vector<128x128xbf16>
    %c0_62 = arith.constant 0 : index
    %c0_63 = arith.constant 0 : index
    %135 = vector.load %arg18[%c0_62, %c0_63] : memref<1x128xf32, #tpu.memory_space<vmem>>, vector<1x128xf32>
    %136 = arith.truncf %133 : vector<8x128xf32> to vector<8x128xbf16>
    %cst_64 = arith.constant dense<0.000000e+00> : vector<8x128xf32>
    %137 = tpu.matmul %136, %134, %cst_64 {dimension_numbers = #tpu.dot_dimension_numbers<[1], [0], [0], [1], [0, 0, 1, 1], [], []>} : vector<8x128xbf16>, vector<128x128xbf16>, vector<8x128xf32> -> vector<8x128xf32>
    %138 = vector.broadcast %135 : vector<1x128xf32> to vector<8x128xf32>
    %139 = arith.addf %137, %138 : vector<8x128xf32>
    %cst_65 = arith.constant 0.000000e+00 : f32
    %140 = vector.broadcast %cst_65 : f32 to vector<8x128xf32>
    %141 = arith.maximumf %139, %140 : vector<8x128xf32>
    %c0_66 = arith.constant 0 : index
    %c0_67 = arith.constant 0 : index
    %142 = vector.load %arg19[%c0_66, %c0_67] : memref<128x128xbf16, #tpu.memory_space<vmem>>, vector<128x128xbf16>
    %c0_68 = arith.constant 0 : index
    %c0_69 = arith.constant 0 : index
    %143 = vector.load %arg20[%c0_68, %c0_69] : memref<1x128xf32, #tpu.memory_space<vmem>>, vector<1x128xf32>
    %144 = arith.truncf %141 : vector<8x128xf32> to vector<8x128xbf16>
    %cst_70 = arith.constant dense<0.000000e+00> : vector<8x128xf32>
    %145 = tpu.matmul %144, %142, %cst_70 {dimension_numbers = #tpu.dot_dimension_numbers<[1], [0], [0], [1], [0, 0, 1, 1], [], []>} : vector<8x128xbf16>, vector<128x128xbf16>, vector<8x128xf32> -> vector<8x128xf32>
    %146 = vector.broadcast %143 : vector<1x128xf32> to vector<8x128xf32>
    %147 = arith.addf %145, %146 : vector<8x128xf32>
    %c0_71 = arith.constant 0 : index
    %c0_72 = arith.constant 0 : index
    %148 = vector.load %arg21[%c0_71, %c0_72] : memref<1x128xf32, #tpu.memory_space<vmem>>, vector<1x128xf32>
    %c0_73 = arith.constant 0 : index
    %c0_74 = arith.constant 0 : index
    %149 = vector.load %arg22[%c0_73, %c0_74] : memref<1x128xf32, #tpu.memory_space<vmem>>, vector<1x128xf32>
    %150 = arith.addf %133, %147 : vector<8x128xf32>
    %cst_75 = arith.constant dense<0.000000e+00> : vector<8xf32>
    %151 = vector.multi_reduction <add>, %150, %cst_75 [1] : vector<8x128xf32> to vector<8xf32>
    %152 = vector.shape_cast %151 : vector<8xf32> to vector<8x1xf32>
    %cst_76 = arith.constant 3.125000e-02 : f32
    %153 = vector.broadcast %cst_76 : f32 to vector<8x1xf32>
    %154 = arith.mulf %152, %153 : vector<8x1xf32>
    %155 = arith.mulf %150, %150 : vector<8x128xf32>
    %cst_77 = arith.constant dense<0.000000e+00> : vector<8xf32>
    %156 = vector.multi_reduction <add>, %155, %cst_77 [1] : vector<8x128xf32> to vector<8xf32>
    %157 = vector.shape_cast %156 : vector<8xf32> to vector<8x1xf32>
    %cst_78 = arith.constant 3.125000e-02 : f32
    %158 = vector.broadcast %cst_78 : f32 to vector<8x1xf32>
    %159 = arith.mulf %157, %158 : vector<8x1xf32>
    %160 = arith.mulf %154, %154 : vector<8x1xf32>
    %161 = arith.subf %159, %160 : vector<8x1xf32>
    %cst_79 = arith.constant 0.000000e+00 : f32
    %162 = vector.broadcast %cst_79 : f32 to vector<8x1xf32>
    %163 = arith.maximumf %161, %162 : vector<8x1xf32>
    %164 = vector.broadcast %154 : vector<8x1xf32> to vector<8x128xf32>
    %165 = arith.subf %150, %164 : vector<8x128xf32>
    %cst_80 = arith.constant 9.99999974E-6 : f32
    %166 = vector.broadcast %cst_80 : f32 to vector<8x1xf32>
    %167 = arith.addf %163, %166 : vector<8x1xf32>
    %168 = math.rsqrt %167 : vector<8x1xf32>
    %169 = vector.broadcast %168 : vector<8x1xf32> to vector<8x128xf32>
    %170 = arith.mulf %165, %169 : vector<8x128xf32>
    %171 = vector.broadcast %148 : vector<1x128xf32> to vector<8x128xf32>
    %172 = arith.mulf %170, %171 : vector<8x128xf32>
    %173 = vector.broadcast %149 : vector<1x128xf32> to vector<8x128xf32>
    %174 = arith.addf %172, %173 : vector<8x128xf32>
    %c0_81 = arith.constant 0 : index
    %c0_82 = arith.constant 0 : index
    %c0_83 = arith.constant 0 : index
    %175 = vector.load %arg23[%c0_81, %c0_82, %c0_83] : memref<1x8x128xf32, #tpu.memory_space<vmem>>, vector<1x8x128xf32>
    %176 = vector.shape_cast %175 : vector<1x8x128xf32> to vector<8x128xf32>
    %177 = vector.shape_cast %174 : vector<8x128xf32> to vector<1x8x128xf32>
    tpu.vector_store %arg23[%c0_81, %c0_82, %c0_83], %177 {strides = array<i32>} : memref<1x8x128xf32, #tpu.memory_space<vmem>>, vector<1x8x128xf32>,
    return
  }
  func.func @transform_0(%arg0: i32) -> (i32, i32, i32) {
    %c0_i32 = arith.constant 0 : i32
    %c0_i32_0 = arith.constant 0 : i32
    %c0_i32_1 = arith.constant 0 : i32
    return %arg0, %c0_i32, %c0_i32_0 : i32, i32, i32
  }
  func.func @transform_1(%arg0: i32) -> (i32, i32, i32) {
    %c0_i32 = arith.constant 0 : i32
    %c0_i32_0 = arith.constant 0 : i32
    %c0_i32_1 = arith.constant 0 : i32
    return %arg0, %c0_i32, %c0_i32_0 : i32, i32, i32
  }
  func.func @transform_2(%arg0: i32) -> (i32, i32) {
    %c0_i32 = arith.constant 0 : i32
    %c0_i32_0 = arith.constant 0 : i32
    %c0_i32_1 = arith.constant 0 : i32
    return %c0_i32, %c0_i32_0 : i32, i32
  }
  func.func @transform_3(%arg0: i32) -> (i32, i32) {
    %c0_i32 = arith.constant 0 : i32
    %c0_i32_0 = arith.constant 0 : i32
    %c0_i32_1 = arith.constant 0 : i32
    return %c0_i32, %c0_i32_0 : i32, i32
  }
  func.func @transform_4(%arg0: i32) -> (i32, i32) {
    %c0_i32 = arith.constant 0 : i32
    %c0_i32_0 = arith.constant 0 : i32
    %c0_i32_1 = arith.constant 0 : i32
    return %c0_i32, %c0_i32_0 : i32, i32
  }
  func.func @transform_5(%arg0: i32) -> (i32, i32) {
    %c0_i32 = arith.constant 0 : i32
    %c0_i32_0 = arith.constant 0 : i32
    %c0_i32_1 = arith.constant 0 : i32
    return %c0_i32, %c0_i32_0 : i32, i32
  }
  func.func @transform_6(%arg0: i32) -> (i32, i32) {
    %c0_i32 = arith.constant 0 : i32
    %c0_i32_0 = arith.constant 0 : i32
    %c0_i32_1 = arith.constant 0 : i32
    return %c0_i32, %c0_i32_0 : i32, i32
  }
  func.func @transform_7(%arg0: i32) -> (i32, i32) {
    %c0_i32 = arith.constant 0 : i32
    %c0_i32_0 = arith.constant 0 : i32
    %c0_i32_1 = arith.constant 0 : i32
    return %c0_i32, %c0_i32_0 : i32, i32
  }
  func.func @transform_8(%arg0: i32) -> (i32, i32) {
    %c0_i32 = arith.constant 0 : i32
    %c0_i32_0 = arith.constant 0 : i32
    %c0_i32_1 = arith.constant 0 : i32
    return %c0_i32, %c0_i32_0 : i32, i32
  }
  func.func @transform_9(%arg0: i32) -> (i32, i32) {
    %c0_i32 = arith.constant 0 : i32
    %c0_i32_0 = arith.constant 0 : i32
    %c0_i32_1 = arith.constant 0 : i32
    return %c0_i32, %c0_i32_0 : i32, i32
  }
  func.func @transform_10(%arg0: i32) -> (i32, i32) {
    %c0_i32 = arith.constant 0 : i32
    %c0_i32_0 = arith.constant 0 : i32
    %c0_i32_1 = arith.constant 0 : i32
    return %c0_i32, %c0_i32_0 : i32, i32
  }
  func.func @transform_11(%arg0: i32) -> (i32, i32) {
    %c0_i32 = arith.constant 0 : i32
    %c0_i32_0 = arith.constant 0 : i32
    %c0_i32_1 = arith.constant 0 : i32
    return %c0_i32, %c0_i32_0 : i32, i32
  }
  func.func @transform_12(%arg0: i32) -> (i32, i32) {
    %c0_i32 = arith.constant 0 : i32
    %c0_i32_0 = arith.constant 0 : i32
    %c0_i32_1 = arith.constant 0 : i32
    return %c0_i32, %c0_i32_0 : i32, i32
  }
  func.func @transform_13(%arg0: i32) -> (i32, i32) {
    %c0_i32 = arith.constant 0 : i32
    %c0_i32_0 = arith.constant 0 : i32
    %c0_i32_1 = arith.constant 0 : i32
    return %c0_i32, %c0_i32_0 : i32, i32
  }
  func.func @transform_14(%arg0: i32) -> (i32, i32) {
    %c0_i32 = arith.constant 0 : i32
    %c0_i32_0 = arith.constant 0 : i32
    %c0_i32_1 = arith.constant 0 : i32
    return %c0_i32, %c0_i32_0 : i32, i32
  }
  func.func @transform_15(%arg0: i32) -> (i32, i32) {
    %c0_i32 = arith.constant 0 : i32
    %c0_i32_0 = arith.constant 0 : i32
    %c0_i32_1 = arith.constant 0 : i32
    return %c0_i32, %c0_i32_0 : i32, i32
  }
  func.func @transform_16(%arg0: i32) -> (i32, i32) {
    %c0_i32 = arith.constant 0 : i32
    %c0_i32_0 = arith.constant 0 : i32
    %c0_i32_1 = arith.constant 0 : i32
    return %c0_i32, %c0_i32_0 : i32, i32
  }
  func.func @transform_17(%arg0: i32) -> (i32, i32) {
    %c0_i32 = arith.constant 0 : i32
    %c0_i32_0 = arith.constant 0 : i32
    %c0_i32_1 = arith.constant 0 : i32
    return %c0_i32, %c0_i32_0 : i32, i32
  }
  func.func @transform_18(%arg0: i32) -> (i32, i32) {
    %c0_i32 = arith.constant 0 : i32
    %c0_i32_0 = arith.constant 0 : i32
    %c0_i32_1 = arith.constant 0 : i32
    return %c0_i32, %c0_i32_0 : i32, i32
  }
  func.func @transform_19(%arg0: i32) -> (i32, i32) {
    %c0_i32 = arith.constant 0 : i32
    %c0_i32_0 = arith.constant 0 : i32
    %c0_i32_1 = arith.constant 0 : i32
    return %c0_i32, %c0_i32_0 : i32, i32
  }
  func.func @transform_20(%arg0: i32) -> (i32, i32) {
    %c0_i32 = arith.constant 0 : i32
    %c0_i32_0 = arith.constant 0 : i32
    %c0_i32_1 = arith.constant 0 : i32
    return %c0_i32, %c0_i32_0 : i32, i32
  }
  func.func @transform_21(%arg0: i32) -> (i32, i32) {
    %c0_i32 = arith.constant 0 : i32
    %c0_i32_0 = arith.constant 0 : i32
    %c0_i32_1 = arith.constant 0 : i32
    return %c0_i32, %c0_i32_0 : i32, i32
  }
  func.func @transform_22(%arg0: i32) -> (i32, i32, i32) {
    %c0_i32 = arith.constant 0 : i32
    %c0_i32_0 = arith.constant 0 : i32
    %c0_i32_1 = arith.constant 0 : i32
    return %arg0, %c0_i32, %c0_i32_0 : i32, i32, i32
  }
}

</mosaic_0001>

<bundles_post_ra>
// kernel: transformer_forward.5
= control target key start
LH: loop header
LB: loop body
LE: loop exit
PB: predicated region body
PF: predicated region fallthrough
CT: control target
= control target key end

     0   :  { %8 = vsyncpa [#allocation3], 0  ;;  %s665_s0 = inlined_call_operand.vmem [shape: f32[2,8,128], index: 0, kind: input, shape index: {}]   ;;  %s666_s1 = inlined_call_operand.vmem [shape: bf16[128,128], index: 1, kind: input, shape index: {}]   ;;  %s667_s2 = inlined_call_operand.vmem [shape: f32[1,128], index: 2, kind: input, shape index: {}]   ;;  %s668_s3 = inlined_call_operand.hbm [shape: f32[2,8,128], index: 3, kind: output, shape index: {}]  }
   0x1   :  { %10 = vsyncpa [#allocation3 + $0x1], 0  ;;  %s538_s12 = smov 0   ;;  %s540_s13 = smov 0  }
   0x2   :  { %s542_s14 = smov 0   ;;  %s544_s15 = smov 0  }
   0x3 LB: > { %s559_s16 = sadd.s32 4294967295, %s513_s15   ;;  %s354_s17 = sadd.s32 4294967294, %s513_s15   ;;  %s513_s15 = sphi %s544_s15, %s674_s15   ;;  %s509_s14 = sphi %s542_s14, %s673_s14   ;;  %s505_s13 = sphi %s540_s13, %s672_s13   ;;  %s501_s12 = sphi %s538_s12, %s671_s12  }
   0x4   : > { %s563_s18 = sadd.s32 1, %s513_s15   ;;  %s91_s19 = sadd.s32 1, %s509_s14 }
   0x5   : > { %s88_s20 = ssub.s32 %s513_s15, %s563_s18  ;;  %p101_p0 = scmp.ne.s32.totalorder %s509_s14, %s505_s13 }
   0x6   : > { %p89_p1 = scmp.eq.s32.totalorder %s88_s20, 0  ;;  %p102_p2 = scmp.eq.s32.totalorder %s559_s16, 1 }
   0x7   : > { %p107_p3 = scmp.ne.s32.totalorder %s505_s13, %s501_s12  ;;  %p108_p4 = scmp.eq.s32.totalorder %s354_s17, 1 }
   0x8   : > { %s574_s21 = scalar_select %p89_p1, %s509_s14, %s91_s19  }
   0x9   : > { %p576_p5 = por %p102_p2, %p101_p0  ;;  %p580_p6 = por %p108_p4, %p107_p3 }
   0xa   : > { %p357_p7 = scmp.ge.s32.totalorder %s513_s15, 1  ;;  %p139_p8 = scmp.lt.s32.totalorder %s513_s15, 3 }
   0xc   : > { %p140_p9 = pnand %p357_p7, %p139_p8 }
   0xd   : > { %v443_v0 = vld [vmem:[%s666_s1] sm:$0xff] (!%p140_p9)   ;;  %v515_v1 = vmov (!%p140_p9), 0.0   ;;  %v444_v2 = vld [vmem:[%s666_s1 + $0x8] sm:$0xff] (!%p140_p9)   ;;  %vm516_vm0 = vmmov (!%p140_p9), 0   ;;  %v445_v3 = vld [vmem:[%s666_s1 + $0x10] sm:$0xff] (!%p140_p9)   ;;  %p162_p10 = scmp.lt.s32.totalorder (!%p140_p9), %s559_s16, 1 }
   0xe   : > { %143 = sbr.rel (%p140_p9) target bundleno = 274 (0x112), region = 32  ;;  %382 = vmatprep.subr.bf16.mxu0 (!%p140_p9), %v515_v1  ;;  %398 = vmatprep.mubr.msk.bf16.mxu0 (!%p140_p9), %vm516_vm0, %v515_v1  ;;  %v446_v4 = vld [vmem:[%s666_s1 + $0x18] sm:$0xff] (!%p140_p9)   ;;  %v447_v5 = vld [vmem:[%s666_s1 + $0x20] sm:$0xff] (!%p140_p9)   ;;  %v448_v6 = vld [vmem:[%s666_s1 + $0x28] sm:$0xff] (!%p140_p9)   ;;  %s159_s27 = sand.u32 (!%p140_p9), 1, %s505_s13  }
   0xf   : > { %383 = vmatpush3.bf16.msra.mxu0 (!%p140_p9), %v443_v0  ;;  %v449_v7 = vld [vmem:[%s666_s1 + $0x30] sm:$0xff] (!%p140_p9)   ;;  %v450_v8 = vld [vmem:[%s666_s1 + $0x38] sm:$0xff] (!%p140_p9)   ;;  %s358_s28 = sshll.u32 (!%p140_p9), %s159_s27, 3  ;;  %v360_v11 = vld [vmem:[%s667_s2] ss:$0 sm:$0xff] (!%p140_p9)  ;;  %s370_s4 = sshll.u32 (!%p140_p9), %s559_s16, 7 }
  0x10   : > { %384 = vmatprep.subr.bf16.mxu0 (!%p140_p9), %v515_v1  ;;  %s161_s5 = scalar_lea.vmem (!%p140_p9), [#allocation2], %s358_s28  ;;  %s623_s9 = scalar_lea.hbm (!%p140_p9), %s668_s3, %s370_s4 }
  0x11   : > { %s295_s6 = sshll.u32 (!%p140_p9), %s161_s5, 4  ;;  %s517_s11 = smov (!%p140_p9), [#allocation2]   ;;  %s625_s6 = int_to_ptr.vmem [resolvable:$true] %s295_s6 }
  0x12   : > { %s455_s17 = sshll.u32 (!%p140_p9), %s517_s11, 4  ;;  %s456_s17 = int_to_ptr.vmem [resolvable:$false] %s455_s17 }
  0x13   : > { %385 = vmatpush3.bf16.msra.mxu0 (!%p140_p9), %v444_v2  ;;  %s457_s19 = scalar_lea.vmem (!%p140_p9), %s456_s17, 256  ;;  %p458_p0 = scmp.lt.s32.totalorder (!%p140_p9), %s625_s6, %s456_s17 }
  0x14   : > { %386 = vmatprep.subr.bf16.mxu0 (!%p140_p9), %v515_v1 }
  0x15   : > { %s163_s7 = scalar_select %p162_p10, %s559_s16, 1 }
  0x16   : > { %s451_s16 = scalar_lea.vmem %s625_s6, 128 }
  0x17   : > { %387 = vmatpush3.bf16.msra.mxu0 %v445_v3  ;;  %s359_s10 = sshll.u32 %s163_s7, 3  ;;  %p452_p11 = scmp.ne.s32.totalorder %s625_s6, %s451_s16 }
  0x18   : > { %388 = vmatprep.subr.bf16.mxu0 %v515_v1  ;;  %s165_s24 = scalar_lea.vmem %s665_s0, %s359_s10  ;;  %s282_s10 = scalar_lea.sflag [#allocation3], %s159_s27 }
  0x19   : > { %v167_v9 = vld [vmem:[%s165_s24] sm:$0xff]  ;;  %p453_p12 = pnand %p452_p11, %p576_p5  ;;  %p459_p1 = scmp.lt.s32.totalorder %s457_s19, %s451_s16 }
  0x1a   : > { %v185_v10 = vpack.c.bf16 %v167_v9, %v167_v9 }
  0x1b   : > { %389 = vmatpush3.bf16.msra.mxu0 %v446_v4  ;;  %p454_p13 = pneg %p453_p12  ;;  %p460_p2 = por %p459_p1, %p458_p0 }
  0x1c   : > { %390 = vmatprep.subr.bf16.mxu0 %v515_v1 }
  0x1d   : > { %p461_p3 = pnand %p460_p2, %p454_p13 }
  0x1f   : > { %391 = vmatpush3.bf16.msra.mxu0 %v447_v5 }
  0x20   : > { %392 = vmatprep.subr.bf16.mxu0 %v515_v1 }
  0x23   : > { %393 = vmatpush3.bf16.msra.mxu0 %v448_v6 }
  0x24   : > { %394 = vmatprep.subr.bf16.mxu0 %v515_v1 }
  0x27   : > { %395 = vmatpush3.bf16.msra.mxu0 %v449_v7 }
  0x28   : > { %396 = vmatprep.subr.bf16.mxu0 %v515_v1 }
  0x2b   : > { %397 = vmatpush3.bf16.msra.mxu0 %v450_v8 }
  0x2e   : > { %399 = vmatmul.mubr.bf16.vlgmr.msra.gmra.mrb[0].mxu0 %v185_v10 }
 0x101   : > { %v274_v12 = vpop.f32.mrb[0].mxu0 }
 0x102   : > { %v275_v13 = vadd.f32 %v360_v11, %v274_v12  ;;  %v400_v14 = vpop.f32.mrb[1].mxu0 }
 0x103   : > { %v277_v15 = vpop.f32.mrb[2].mxu0 }
 0x104   : > { %280 = vst [vmem:[%s161_s5] sm:$0xff] %v275_v13  ;;  %v401_v16 = vpop.f32.mrb[3].mxu0 }
 0x105   : > { %464 = shalt.err (!%p461_p3)
}
 0x106   : > { %s465_s20 = scalar_lea.hbm %s623_s9, 128  ;;  %s469_s26 = scalar_lea.hbm %s668_s3, 256 }
 0x107   : > { %p466_p4 = scmp.ne.s32.totalorder %s623_s9, %s465_s20  ;;  %p470_p9 = scmp.lt.u32.totalorder %s623_s9, %s668_s3 }
 0x108   : > { %p471_p10 = scmp.lt.u32.totalorder %s469_s26, %s465_s20  ;;  %p473_p12 = scmp.lt.u32.totalorder %s465_s20, %s623_s9 }
 0x109   : > { %p467_p7 = pnand %p466_p4, %p576_p5 }
 0x10a   : > { %p472_p11 = por %p471_p10, %p470_p9 }
 0x10b   : > { %p468_p8 = pneg %p467_p7 }
 0x10c   : > { %p474_p13 = por %p473_p12, %p472_p11 }
 0x10e   : > { %p475_p0 = pnand %p474_p13, %p468_p8 }
 0x110   : > { %478 = shalt.err (!%p475_p0)
}
 0x111   : > { %402 = dma.vmem_to_hbm [thread:$0]  (%p576_p5), %s625_s6, 128, %s623_s9, %s282_s10  }
 0x112 PF: > { %p408_p1 = scmp.ge.s32.totalorder %s513_s15, 2  ;;  %s307_s29 = sand.u32 1, %s501_s12  }
 0x113   : > { %s308_s30 = scalar_lea.sflag [#allocation3], %s307_s29 }
 0x114   : > { %p405_p2 = pnand %p408_p1, %p580_p6 }
 0x116   : > { %496 = dma.done.wait (!%p405_p2), %s308_s30, 128  }
 0x117   : > { %498 = vsyncadd (!%p405_p2), %s308_s30, 4294967168  ;;  %p13_p3 = scmp.ge.s32.totalorder %s563_s18, 4   ;;  %s671_s12 = smov %s505_s13 }
 0x118   : > { %s672_s13 = smov %s509_s14  ;;  %s673_s14 = smov %s574_s21 }
 0x119   : > { %s674_s15 = smov %s563_s18  ;;  %15 = sbr.rel (!%p13_p3) target bundleno = 3 (0x3), region = 67 }
 0x120   :  { %313 = vsyncpa [#allocation3], 1 }
 0x121   :  { %315 = vsyncpa [#allocation3 + $0x1], 1 }

// kernel: transformer_forward.3
= control target key start
LH: loop header
LB: loop body
LE: loop exit
PB: predicated region body
PF: predicated region fallthrough
CT: control target
= control target key end

     0   :  { %s1607_s25 = smov 0   ;;  %s1853_s0 = inlined_call_operand.vmem [shape: f32[2,8,128], index: 0, kind: input, shape index: {}]   ;;  %s1854_s1 = inlined_call_operand.vmem [shape: bf16[128,384], index: 1, kind: input, shape index: {}]   ;;  %s1855_s2 = inlined_call_operand.vmem [shape: f32[1,384], index: 2, kind: input, shape index: {}]   ;;  %s1856_s3 = inlined_call_operand.vmem [shape: bf16[128,128], index: 3, kind: input, shape index: {}]   ;;  %s1857_s4 = inlined_call_operand.vmem [shape: f32[1,128], index: 4, kind: input, shape index: {}]   ;;  %s1858_s5 = inlined_call_operand.vmem [shape: f32[1,128], index: 5, kind: input, shape index: {}]   ;;  %s1859_s6 = inlined_call_operand.vmem [shape: f32[1,128], index: 6, kind: input, shape index: {}]   ;;  %s1860_s7 = inlined_call_operand.vmem [shape: bf16[128,128], index: 7, kind: input, shape index: {}]   ;;  %s1861_s8 = inlined_call_operand.vmem [shape: f32[1,128], index: 8, kind: input, shape index: {}]   ;;  %s1862_s9 = inlined_call_operand.vmem [shape: bf16[128,128], index: 9, kind: input, shape index: {}]   ;;  %s1863_s10 = inlined_call_operand.vmem [shape: f32[1,128], index: 10, kind: input, shape index: {}]   ;;  %s1864_s11 = inlined_call_operand.vmem [shape: f32[1,128], index: 11, kind: input, shape index: {}]   ;;  %s1865_s12 = inlined_call_operand.vmem [shape: f32[1,128], index: 12, kind: input, shape index: {}]   ;;  %s1866_s13 = inlined_call_operand.vmem [shape: f32[2,8,128], index: 13, kind: output, shape index: {}]  }
   0x1 LB: > { %s1254_s26 = sadd.s32 4294967295, %s1532_s25   ;;  %p1258_p0 = scmp.ge.s32.totalorder %s1532_s25, 1  ;;  %s1532_s25 = sphi %s1607_s25, %s23_s25  }
   0x2   : > { %p386_p1 = scmp.lt.s32.totalorder %s1532_s25, 3 }
   0x4   : > { %p387_p2 = pnand %p1258_p0, %p386_p1 }
   0x5   : > { %v1462_v0 = vld [vmem:[%s1854_s1 + $0x4] ss:$12 sps:$4 sm:$0xff] (!%p387_p2)   ;;  %v1464_v1 = vld [vmem:[%s1854_s1] ss:$12 sps:$4 sm:$0xff] (!%p387_p2)   ;;  %v1534_v2 = vmov (!%p387_p2), 0   ;;  %v1535_v4 = vmov (!%p387_p2), 0.0   ;;  %v473_v28 = vlaneseq (!%p387_p2) }
   0x6   : > { %390 = sbr.rel (%p387_p2) target bundleno = 1999 (0x7cf), region = 72  ;;  %648 = vmatprep.mubr.bf16.mxu0 (!%p387_p2), %v1534_v2  ;;  %616 = vmatprep.subr.bf16.mxu0 (!%p387_p2), %v1462_v0  ;;  %v1465_v3 = vld [vmem:[%s1854_s1 + $0x1c] ss:$12 sps:$4 sm:$0xff] (!%p387_p2)   ;;  %v1467_v5 = vld [vmem:[%s1854_s1 + $0x18] ss:$12 sps:$4 sm:$0xff] (!%p387_p2)   ;;  %p428_p3 = scmp.lt.s32.totalorder (!%p387_p2), %s1254_s26, 1 }
   0x7   : > { %1359 = vmatprep.subr.bf16.mxu1 (!%p387_p2), %v1535_v4  ;;  %617 = vmatpush1.bf16.msra.mxu0 (!%p387_p2), %v1464_v1  ;;  %v1468_v6 = vld [vmem:[%s1854_s1 + $0x34] ss:$12 sps:$4 sm:$0xff] (!%p387_p2)   ;;  %v1470_v7 = vld [vmem:[%s1854_s1 + $0x30] ss:$12 sps:$4 sm:$0xff] (!%p387_p2)   ;;  %v1471_v8 = vld [vmem:[%s1854_s1 + $0x4c] ss:$12 sps:$4 sm:$0xff] (!%p387_p2)  }
   0x8   : > { %618 = vmatprep.subr.bf16.mxu0 (!%p387_p2), %v1465_v3  ;;  %v1473_v9 = vld [vmem:[%s1854_s1 + $0x48] ss:$12 sps:$4 sm:$0xff] (!%p387_p2)   ;;  %v1474_v11 = vld [vmem:[%s1854_s1 + $0x64] ss:$12 sps:$4 sm:$0xff] (!%p387_p2)   ;;  %v1487_v12 = vld [vmem:[%s1854_s1 + $0x20] ss:$12 sps:$4 sm:$0xff] (!%p387_p2)  }
   0x9   : > { %v1486_v10 = vld [vmem:[%s1854_s1 + $0x8] ss:$12 sps:$4 sm:$0xff] (!%p387_p2)   ;;  %v1476_v13 = vld [vmem:[%s1854_s1 + $0x60] ss:$12 sps:$4 sm:$0xff] (!%p387_p2)   ;;  %v1479_v15 = vld [vmem:[%s1854_s1 + $0x78] ss:$12 sps:$4 sm:$0xff] (!%p387_p2)  }
   0xa   : > { %1360 = vmatpush3.bf16.msra.mxu1 (!%p387_p2), %v1486_v10  ;;  %v1477_v14 = vld [vmem:[%s1854_s1 + $0x7c] ss:$12 sps:$4 sm:$0xff] (!%p387_p2)   ;;  %v1488_v16 = vld [vmem:[%s1854_s1 + $0x38] ss:$12 sps:$4 sm:$0xff] (!%p387_p2)   ;;  %v1480_v17 = vld [vmem:[%s1854_s1 + $0x94] ss:$12 sps:$4 sm:$0xff] (!%p387_p2)  }
   0xb   : > { %619 = vmatpush1.bf16.msra.mxu0 (!%p387_p2), %v1467_v5  ;;  %1361 = vmatprep.subr.bf16.mxu1 (!%p387_p2), %v1535_v4  ;;  %v1489_v18 = vld [vmem:[%s1854_s1 + $0x50] ss:$12 sps:$4 sm:$0xff] (!%p387_p2)   ;;  %v1483_v20 = vld [vmem:[%s1854_s1 + $0xac] ss:$12 sps:$4 sm:$0xff] (!%p387_p2)   ;;  %v1490_v21 = vld [vmem:[%s1854_s1 + $0x68] ss:$12 sps:$4 sm:$0xff] (!%p387_p2)  }
   0xc   : > { %620 = vmatprep.subr.bf16.mxu0 (!%p387_p2), %v1468_v6  ;;  %v1482_v19 = vld [vmem:[%s1854_s1 + $0x90] ss:$12 sps:$4 sm:$0xff] (!%p387_p2)   ;;  %v1485_v22 = vld [vmem:[%s1854_s1 + $0xa8] ss:$12 sps:$4 sm:$0xff] (!%p387_p2)   ;;  %v1491_v24 = vld [vmem:[%s1854_s1 + $0x80] ss:$12 sps:$4 sm:$0xff] (!%p387_p2)  }
   0xd   : > { %s1868_s26 = smov (!%p428_p3, %s1254_s26), 1  ;;  %v1492_v26 = vld [vmem:[%s1854_s1 + $0x98] ss:$12 sps:$4 sm:$0xff]   ;;  %v1493_v27 = vld [vmem:[%s1854_s1 + $0xb0] ss:$12 sps:$4 sm:$0xff]   ;;  %vm1536_vm0 = vmmov 0  }
   0xe   : > { %s1259_s17 = sshll.u32 %s1868_s26, 3  ;;  %1362 = vmatpush3.bf16.msra.mxu1 %v1487_v12  ;;  %1375 = vmatprep.mubr.msk.bf16.mxu1 %vm1536_vm0, %v1535_v4  ;;  %v474_v29 = vshrl.u32 %v473_v28, 7  ;;  %v470_v31 = vld [vmem:[%s1855_s2] sm:$0x7]  ;;  %vm757_vm1 = vcmask 1043456   ;;  %vm740_vm2 = vcmask 64512  }
   0xf   : > { %621 = vmatpush1.bf16.msra.mxu0 %v1470_v7  ;;  %1363 = vmatprep.subr.bf16.mxu1 %v1535_v4  ;;  %s431_s22 = scalar_lea.vmem %s1853_s0, %s1259_s17  ;;  %v1494_v63 = vld [vmem:[%s1856_s3] sm:$0xff]   ;;  %v1495_v0 = vld [vmem:[%s1856_s3 + $0x8] sm:$0xff]   ;;  %v1496_v1 = vld [vmem:[%s1856_s3 + $0x10] sm:$0xff]   ;;  %s435_s14 = scalar_lea.vmem %s1866_s13, %s1259_s17 }
  0x10   : > { %622 = vmatprep.subr.bf16.mxu0 %v1471_v8  ;;  %v1690_v23 = vld [vmem:[%s431_s22] sm:$0xff]  ;;  %v479_v30 = vsub.s32 1, %v474_v29  ;;  %v475_v33 = vsub.s32 0, %v474_v29  ;;  %v483_v43 = vsub.s32 2, %v474_v29  ;;  %v1497_v2 = vld [vmem:[%s1856_s3 + $0x18] sm:$0xff]   ;;  %v1499_v5 = vld [vmem:[%s1856_s3 + $0x28] sm:$0xff]  }
  0x11   : > { %v471_v25 = vpack.c.bf16 %v1690_v23, %v1690_v23  ;;  %v1498_v3 = vld [vmem:[%s1856_s3 + $0x20] sm:$0xff]   ;;  %v1500_v6 = vld [vmem:[%s1856_s3 + $0x30] sm:$0xff]   ;;  %v1505_v28 = vld [vmem:[%s1860_s7 + $0x18] sm:$0xff]  }
  0x12   : > { %1364 = vmatpush3.bf16.msra.mxu1 %v1488_v16  ;;  %v480_v32 = vrot.slane %v470_v31, %v479_v30  ;;  %v476_v38 = vrot.slane %v470_v31, %v475_v33  ;;  %v484_v44 = vrot.slane %v470_v31, %v483_v43  ;;  %v1506_v29 = vld [vmem:[%s1860_s7 + $0x20] sm:$0xff]   ;;  %v1507_v30 = vld [vmem:[%s1860_s7 + $0x28] sm:$0xff]   ;;  %v1508_v31 = vld [vmem:[%s1860_s7 + $0x30] sm:$0xff]  }
  0x13   : > { %623 = vmatpush1.bf16.msra.mxu0 %v1473_v9  ;;  %1365 = vmatprep.subr.bf16.mxu1 %v1535_v4  ;;  %v1510_v33 = vld [vmem:[%s1862_s9] sm:$0xff]  }
  0x14   : > { %624 = vmatprep.subr.bf16.mxu0 %v1474_v11  ;;  %v1501_v11 = vld [vmem:[%s1856_s3 + $0x38] sm:$0xff]  }
  0x16   : > { %1366 = vmatpush3.bf16.msra.mxu1 %v1489_v18 }
  0x17   : > { %625 = vmatpush1.bf16.msra.mxu0 %v1476_v13  ;;  %1367 = vmatprep.subr.bf16.mxu1 %v1535_v4 }
  0x18   : > { %626 = vmatprep.subr.bf16.mxu0 %v1477_v14 }
  0x1a   : > { %1368 = vmatpush3.bf16.msra.mxu1 %v1490_v21 }
  0x1b   : > { %627 = vmatpush1.bf16.msra.mxu0 %v1479_v15  ;;  %1369 = vmatprep.subr.bf16.mxu1 %v1535_v4 }
  0x1c   : > { %628 = vmatprep.subr.bf16.mxu0 %v1480_v17  ;;  %v1286_v17 = vld [vmem:[%s1857_s4] ss:$0 sm:$0xff] }
  0x1e   : > { %1370 = vmatpush3.bf16.msra.mxu1 %v1491_v24 }
  0x1f   : > { %629 = vmatpush1.bf16.msra.mxu0 %v1482_v19  ;;  %1371 = vmatprep.subr.bf16.mxu1 %v1535_v4 }
  0x20   : > { %630 = vmatprep.subr.bf16.mxu0 %v1483_v20 }
  0x22   : > { %1372 = vmatpush3.bf16.msra.mxu1 %v1492_v26  ;;  %v1502_v26 = vld [vmem:[%s1860_s7] sm:$0xff]  }
  0x23   : > { %631 = vmatpush1.bf16.msra.mxu0 %v1485_v22  ;;  %1373 = vmatprep.subr.bf16.mxu1 %v1535_v4 }
  0x24   : > { %1391 = vmatprep.subr.bf16.mxu0 %v1535_v4 }
  0x26   : > { %649 = vmatmul.mubr.bf16.vlgmr.msra.gmra.mrb[0].mxu0 %v471_v25  ;;  %1374 = vmatpush3.bf16.msra.mxu1 %v1493_v27  ;;  %v1503_v27 = vld [vmem:[%s1860_s7 + $0x8] sm:$0xff]  }
  0x27   : > { %1379 = vmatprep.subr.bf16.mxu1 %v1535_v4  ;;  %1407 = vmatprep.mubr.msk.bf16.mxu0 %vm1536_vm0, %v1535_v4 }
  0x28   : > { %1392 = vmatpush3.bf16.msra.mxu0 %v1494_v63 }
  0x29   : > { %1376 = vmatmul.mubr.bf16.vlgmr.msra.gmra.mrb[0].mxu1 %v471_v25  ;;  %1393 = vmatprep.subr.bf16.mxu0 %v1535_v4 }
  0x2a   : > { %1381 = vmatprep.mubr.msk.bf16.mxu1 %vm1536_vm0, %v1535_v4 }
  0x2c   : > { %1394 = vmatpush3.bf16.msra.mxu0 %v1495_v0 }
  0x2d   : > { %1395 = vmatprep.subr.bf16.mxu0 %v1535_v4 }
  0x30   : > { %1396 = vmatpush3.bf16.msra.mxu0 %v1496_v1 }
  0x31   : > { %1397 = vmatprep.subr.bf16.mxu0 %v1535_v4 }
  0x34   : > { %1398 = vmatpush3.bf16.msra.mxu0 %v1497_v2 }
  0x35   : > { %1399 = vmatprep.subr.bf16.mxu0 %v1535_v4 }
  0x38   : > { %1400 = vmatpush3.bf16.msra.mxu0 %v1498_v3 }
  0x39   : > { %1401 = vmatprep.subr.bf16.mxu0 %v1535_v4 }
  0x3c   : > { %1402 = vmatpush3.bf16.msra.mxu0 %v1499_v5 }
  0x3d   : > { %1403 = vmatprep.subr.bf16.mxu0 %v1535_v4 }
  0x40   : > { %1404 = vmatpush3.bf16.msra.mxu0 %v1500_v6 }
  0x41   : > { %1405 = vmatprep.subr.bf16.mxu0 %v1535_v4 }
  0x44   : > { %1406 = vmatpush3.bf16.msra.mxu0 %v1501_v11 }
  0x45   : > { %1431 = vmatprep.subr.bf16.mxu0 %v1535_v4 }
  0xf9   : > { %v650_v34 = vpop.f32.mrb[0].mxu0 }
  0xfa   : > { %v652_v35 = vpop.f32.mrb[1].mxu0  ;;  %v651_v41 = vadd.f32 %v650_v34, %v476_v38  ;;  %v1511_v34 = vld [vmem:[%s1862_s9 + $0x8] sm:$0xff]  }
  0xfb   : > { %v653_v36 = vadd.f32 %v652_v35, %v480_v32  ;;  %v654_v37 = vpop.f32.mrb[2].mxu0  ;;  %v1509_v32 = vld [vmem:[%s1860_s7 + $0x38] sm:$0xff]   ;;  %v1512_v35 = vld [vmem:[%s1862_s9 + $0x10] sm:$0xff]   ;;  %v1515_v38 = vld [vmem:[%s1862_s9 + $0x28] sm:$0xff]  }
  0xfc   : > { %v655_v39 = vpop.f32.mrb[3].mxu0  ;;  %v697_v42 = vpack.c.bf16 %v651_v41, %v651_v41  ;;  %v691_v45 = vpop.f32.mrb[0].mxu1  ;;  %v1514_v37 = vld [vmem:[%s1862_s9 + $0x20] sm:$0xff]  }
  0xfd   : > { %v698_v40 = vpack.c.bf16 %v653_v36, %v653_v36  ;;  %v692_v46 = vadd.f32 %v691_v45, %v484_v44  ;;  %v1377_v47 = vpop.f32.mrb[1].mxu1  ;;  %v1513_v36 = vld [vmem:[%s1862_s9 + $0x18] sm:$0xff]  }
  0xfe   : > { %v694_v48 = vpop.f32.mrb[2].mxu1 }
  0xff   : > { %1380 = vmatpush3.bf16.xpose.msra.mxu1 %v698_v40  ;;  %v753_v49 = vpack.c.bf16 %v692_v46, %v692_v46  ;;  %v1378_v50 = vpop.f32.mrb[3].mxu1 }
 0x100   : > { %1385 = vmatprep.subr.bf16.mxu1 %v1535_v4 }
 0x101   : > { %v759_v51 = vsel %vm757_vm1, %v753_v49, 0  ;;  %v1295_v49 = vld [vmem:[%s1858_s5] ss:$0 sm:$0xff] }
 0x106   : > { %1382 = vmatmul.mubr.bf16.vlgmr.msra.gmra.mrb[4].mxu1 %v697_v42 }
 0x107   : > { %1387 = vmatprep.mubr.msk.bf16.mxu1 %vm1536_vm0, %v1535_v4  ;;  %1386 = vmatpush3.bf16.msra.mxu1 %v759_v51  ;;  %v1296_v51 = vld [vmem:[%s1859_s6] ss:$0 sm:$0xff] }
 0x108   : > { %1411 = vmatprep.subr.bf16.mxu1 %v1535_v4 }
 0x1d9   : > { %v733_v52 = vpop.f32.mrb[4].mxu1 }
 0x1da   : > { %v739_v53 = vmul.f32 0.17677669, %v733_v52  ;;  %v1383_v54 = vpop.f32.mrb[5].mxu1 }
 0x1db   : > { %v736_v55 = vpop.f32.mrb[6].mxu1 }
 0x1dc   : > { %v1384_v56 = vpop.f32.mrb[7].mxu1  ;;  %v741_v57 = vsel %vm740_vm2, %v739_v53, -inf  ;;  %v1516_v55 = vld [vmem:[%s1862_s9 + $0x30] sm:$0xff]  }
 0x1dd   : > { %742 = vmax.xlane.f32.xlu0 %v741_v57  ;;  %v1517_v56 = vld [vmem:[%s1862_s9 + $0x38] sm:$0xff]   ;;  %v1297_v57 = vld [vmem:[%s1861_s8] ss:$0 sm:$0xff] }
 0x26a   : > { %v743_v58 = vpop.xlane.xlu0 %742 }
 0x26b   : > { %v744_v59 = vsub.f32 %v739_v53, %v743_v58 }
 0x26d   : > { %v745_v60 = vmul.f32 1.442695, %v744_v59 }
 0x26f   : > { %1518 = vpow2.f32 %v745_v60 }
 0x279   : > { %v1519_v61 = vpop.eup %1518 }
 0x27a   : > { %v747_v62 = vsel %vm740_vm2, %v1519_v61, 0.0 }
 0x27b   : > { %748 = vadd.xlane.f32.xlu0 %v747_v62 }
 0x308   : > { %v749_v7 = vpop.xlane.xlu0 %748 }
 0x309   : > { %1520 = vrcp.f32 %v749_v7 }
 0x313   : > { %v1521_v8 = vpop.eup %1520 }
 0x314   : > { %v751_v9 = vmul.f32 %v1521_v8, %v1519_v61 }
 0x316   : > { %v752_v10 = vpack.c.bf16 %v751_v9, %v751_v9 }
 0x318   : > { %1388 = vmatmul.mubr.msk.bf16.vlgmr.msra.gmra.mrb[8].mxu1 %vm740_vm2, %v752_v10 }
 0x319   : > { %1427 = vmatprep.mubr.msk.bf16.mxu1 %vm1536_vm0, %v1535_v4  ;;  %1412 = vmatpush3.bf16.msra.mxu1 %v1502_v26 }
 0x31a   : > { %1413 = vmatprep.subr.bf16.mxu1 %v1535_v4 }
 0x31d   : > { %1414 = vmatpush3.bf16.msra.mxu1 %v1503_v27 }
 0x31e   : > { %1415 = vmatprep.subr.bf16.mxu1 %v1535_v4 }
 0x3eb   : > { %v795_v12 = vpop.f32.mrb[8].mxu1 }
 0x3ec   : > { %v818_v13 = vpack.c.bf16 %v795_v12, %v795_v12  ;;  %v1389_v14 = vpop.f32.mrb[9].mxu1 }
 0x3ed   : > { %v798_v15 = vpop.f32.mrb[10].mxu1 }
 0x3ee   : > { %v1390_v16 = vpop.f32.mrb[11].mxu1  ;;  %1408 = vmatmul.mubr.bf16.vlgmr.msra.gmra.mrb[4].mxu0 %v818_v13 }
 0x3ef   : > { %1447 = vmatprep.mubr.msk.bf16.mxu0 %vm1536_vm0, %v1535_v4  ;;  %1432 = vmatpush3.bf16.msra.mxu0 %v1510_v33 }
 0x3f0   : > { %1433 = vmatprep.subr.bf16.mxu0 %v1535_v4 }
 0x3f3   : > { %1434 = vmatpush3.bf16.msra.mxu0 %v1511_v34 }
 0x3f4   : > { %1435 = vmatprep.subr.bf16.mxu0 %v1535_v4 }
 0x3f7   : > { %1436 = vmatpush3.bf16.msra.mxu0 %v1512_v35 }
 0x3f8   : > { %1437 = vmatprep.subr.bf16.mxu0 %v1535_v4 }
 0x3fb   : > { %1438 = vmatpush3.bf16.msra.mxu0 %v1513_v36 }
 0x3fc   : > { %1439 = vmatprep.subr.bf16.mxu0 %v1535_v4 }
 0x3ff   : > { %1440 = vmatpush3.bf16.msra.mxu0 %v1514_v37 }
 0x400   : > { %1441 = vmatprep.subr.bf16.mxu0 %v1535_v4 }
 0x403   : > { %1442 = vmatpush3.bf16.msra.mxu0 %v1515_v38 }
 0x404   : > { %1443 = vmatprep.subr.bf16.mxu0 %v1535_v4 }
 0x407   : > { %1444 = vmatpush3.bf16.msra.mxu0 %v1516_v55 }
 0x408   : > { %1445 = vmatprep.subr.bf16.mxu0 %v1535_v4 }
 0x40b   : > { %1446 = vmatpush3.bf16.msra.mxu0 %v1517_v56 }
 0x4c1   : > { %v907_v18 = vpop.f32.mrb[4].mxu0 }
 0x4c2   : > { %v908_v19 = vadd.f32 %v1286_v17, %v907_v18  ;;  %v1409_v20 = vpop.f32.mrb[5].mxu0 }
 0x4c3   : > { %v910_v21 = vpop.f32.mrb[6].mxu0 }
 0x4c4   : > { %v915_v22 = vadd.f32 %v908_v19, %v1690_v23  ;;  %v1410_v24 = vpop.f32.mrb[7].mxu0  ;;  %v1504_v23 = vld [vmem:[%s1860_s7 + $0x10] sm:$0xff]   ;;  %v1315_v19 = vld [vmem:[%s1864_s11] ss:$0 sm:$0xff] }
 0x4c5   : > { %1416 = vmatpush3.bf16.msra.mxu1 %v1504_v23  ;;  %v1316_v21 = vld [vmem:[%s1865_s12] ss:$0 sm:$0xff] }
 0x4c6   : > { %916 = vadd.xlane.f32.xlu1 %v915_v22  ;;  %v919_v25 = vmul.f32 %v915_v22, %v915_v22  ;;  %1417 = vmatprep.subr.bf16.mxu1 %v1535_v4 }
 0x4c9   : > { %1418 = vmatpush3.bf16.msra.mxu1 %v1505_v28 }
 0x4ca   : > { %920 = vadd.xlane.f32.xlu1 %v919_v25  ;;  %1419 = vmatprep.subr.bf16.mxu1 %v1535_v4 }
 0x4cd   : > { %1420 = vmatpush3.bf16.msra.mxu1 %v1506_v29 }
 0x4ce   : > { %1421 = vmatprep.subr.bf16.mxu1 %v1535_v4 }
 0x4d1   : > { %1422 = vmatpush3.bf16.msra.mxu1 %v1507_v30 }
 0x4d2   : > { %1423 = vmatprep.subr.bf16.mxu1 %v1535_v4 }
 0x4d5   : > { %1424 = vmatpush3.bf16.msra.mxu1 %v1508_v31 }
 0x4d6   : > { %1425 = vmatprep.subr.bf16.mxu1 %v1535_v4  ;;  %v1306_v4 = vld [vmem:[%s1863_s10] ss:$0 sm:$0xff] }
 0x4d9   : > { %1426 = vmatpush3.bf16.msra.mxu1 %v1509_v32 }
 0x553   : > { %v917_v39 = vpop.xlane.xlu1 %916 }
 0x554   : > { %v918_v40 = vmul.f32 0.03125, %v917_v39 }
 0x556   : > { %v923_v42 = vmul.f32 %v918_v40, %v918_v40  ;;  %v926_v47 = vsub.f32 %v915_v22, %v918_v40 }
 0x557   : > { %v921_v41 = vpop.xlane.xlu1 %920 }
 0x558   : > { %v922_v43 = vmul.f32 0.03125, %v921_v41 }
 0x55a   : > { %v924_v44 = vsub.f32 %v922_v43, %v923_v42 }
 0x55c   : > { %v925_v45 = vmax.f32 %v924_v44, 0.0 }
 0x55e   : > { %v927_v46 = vadd.f32 1e-05, %v925_v45 }
 0x560   : > { %1522 = vrsqrt.f32 %v927_v46 }
 0x56a   : > { %v1523_v48 = vpop.eup %1522 }
 0x56b   : > { %v929_v50 = vmul.f32 %v1523_v48, %v926_v47 }
 0x56d   : > { %v936_v52 = vmul.f32 %v1295_v49, %v929_v50 }
 0x56f   : > { %v943_v53 = vadd.f32 %v1296_v51, %v936_v52 }
 0x571   : > { %v961_v54 = vpack.c.bf16 %v943_v53, %v943_v53 }
 0x573   : > { %1428 = vmatmul.mubr.bf16.vlgmr.msra.gmra.mrb[12].mxu1 %v961_v54 }
 0x646   : > { %v1050_v58 = vpop.f32.mrb[12].mxu1 }
 0x647   : > { %v1051_v59 = vadd.f32 %v1297_v57, %v1050_v58  ;;  %v1429_v60 = vpop.f32.mrb[13].mxu1 }
 0x648   : > { %v1053_v61 = vpop.f32.mrb[14].mxu1 }
 0x649   : > { %v1056_v62 = vmax.f32 %v1051_v59, 0.0  ;;  %v1430_v63 = vpop.f32.mrb[15].mxu1 }
 0x64b   : > { %v1074_v0 = vpack.c.bf16 %v1056_v62, %v1056_v62 }
 0x64d   : > { %1448 = vmatmul.mubr.bf16.vlgmr.msra.gmra.mrb[8].mxu0 %v1074_v0 }
 0x720   : > { %v1163_v1 = vpop.f32.mrb[8].mxu0 }
 0x721   : > { %v1164_v2 = vadd.f32 %v1306_v4, %v1163_v1  ;;  %v1449_v3 = vpop.f32.mrb[9].mxu0 }
 0x722   : > { %v1166_v5 = vpop.f32.mrb[10].mxu0 }
 0x723   : > { %v1171_v6 = vadd.f32 %v1164_v2, %v943_v53  ;;  %v1450_v7 = vpop.f32.mrb[11].mxu0 }
 0x725   : > { %1172 = vadd.xlane.f32.xlu0 %v1171_v6  ;;  %v1175_v8 = vmul.f32 %v1171_v6, %v1171_v6 }
 0x727   : > { %1176 = vadd.xlane.f32.xlu1 %v1175_v8 }
 0x7b2   : > { %v1173_v9 = vpop.xlane.xlu0 %1172 }
 0x7b3   : > { %v1174_v10 = vmul.f32 0.03125, %v1173_v9 }
 0x7b4   : > { %v1177_v11 = vpop.xlane.xlu1 %1176 }
 0x7b5   : > { %v1179_v12 = vmul.f32 %v1174_v10, %v1174_v10  ;;  %v1178_v13 = vmul.f32 0.03125, %v1177_v11  ;;  %v1182_v17 = vsub.f32 %v1171_v6, %v1174_v10 }
 0x7b7   : > { %v1180_v14 = vsub.f32 %v1178_v13, %v1179_v12 }
 0x7b9   : > { %v1181_v15 = vmax.f32 %v1180_v14, 0.0 }
 0x7bb   : > { %v1183_v16 = vadd.f32 1e-05, %v1181_v15 }
 0x7bd   : > { %1524 = vrsqrt.f32 %v1183_v16 }
 0x7c7   : > { %v1525_v18 = vpop.eup %1524 }
 0x7c8   : > { %v1185_v20 = vmul.f32 %v1525_v18, %v1182_v17 }
 0x7ca   : > { %v1192_v22 = vmul.f32 %v1315_v19, %v1185_v20 }
 0x7cc   : > { %v1199_v24 = vadd.f32 %v1316_v21, %v1192_v22 }
 0x7ce   : > { %1200 = vst [vmem:[%s435_s14] sm:$0xff] %v1199_v24 }
 0x7cf PF: > { %s23_s25 = sadd.s32 1, %s1532_s25  }
 0x7d0   : > { %p20_p4 = scmp.ge.s32.totalorder %s23_s25, 4  }
 0x7d2   :  { %22 = sbr.rel (!%p20_p4) target bundleno = 1 (0x1), region = 102 }

// kernel: transformer_forward.4
= control target key start
LH: loop header
LB: loop body
LE: loop exit
PB: predicated region body
PF: predicated region fallthrough
CT: control target
= control target key end

     0   :  { %s3342_s0 = inlined_call_operand.vmem [shape: f32[2,8,128], index: 0, kind: input, shape index: {}]   ;;  %s3343_s1 = inlined_call_operand.vmem [shape: f32[2,8,128], index: 1, kind: input, shape index: {}]   ;;  %s3344_s2 = inlined_call_operand.vmem [shape: bf16[128,384], index: 2, kind: input, shape index: {}]   ;;  %s3345_s3 = inlined_call_operand.vmem [shape: f32[1,384], index: 3, kind: input, shape index: {}]   ;;  %s3346_s4 = inlined_call_operand.vmem [shape: bf16[128,128], index: 4, kind: input, shape index: {}]   ;;  %s3347_s5 = inlined_call_operand.vmem [shape: f32[1,128], index: 5, kind: input, shape index: {}]   ;;  %s3348_s6 = inlined_call_operand.vmem [shape: f32[1,128], index: 6, kind: input, shape index: {}]   ;;  %s3349_s7 = inlined_call_operand.vmem [shape: f32[1,128], index: 7, kind: input, shape index: {}]   ;;  %s3350_s8 = inlined_call_operand.hbm [shape: bf16[128,128], index: 8, kind: input, shape index: {}]   ;;  %s3351_s9 = inlined_call_operand.vmem [shape: f32[1,128], index: 9, kind: input, shape index: {}]   ;;  %s3352_s10 = inlined_call_operand.vmem [shape: bf16[128,256], index: 10, kind: input, shape index: {}]   ;;  %s3353_s11 = inlined_call_operand.vmem [shape: f32[1,256], index: 11, kind: input, shape index: {}]   ;;  %s3354_s12 = inlined_call_operand.hbm [shape: bf16[128,128], index: 12, kind: input, shape index: {}]   ;;  %s3355_s13 = inlined_call_operand.vmem [shape: f32[1,128], index: 13, kind: input, shape index: {}]   ;;  %s3356_s14 = inlined_call_operand.vmem [shape: f32[1,128], index: 14, kind: input, shape index: {}]   ;;  %s3357_s15 = inlined_call_operand.vmem [shape: f32[1,128], index: 15, kind: input, shape index: {}]   ;;  %s3358_s16 = inlined_call_operand.hbm [shape: bf16[128,128], index: 16, kind: input, shape index: {}]   ;;  %s3359_s17 = inlined_call_operand.vmem [shape: f32[1,128], index: 17, kind: input, shape index: {}]   ;;  %s3360_s18 = inlined_call_operand.hbm [shape: bf16[128,128], index: 18, kind: input, shape index: {}]   ;;  %s3361_s19 = inlined_call_operand.vmem [shape: f32[1,128], index: 19, kind: input, shape index: {}]   ;;  %s3362_s20 = inlined_call_operand.vmem [shape: f32[1,128], index: 20, kind: input, shape index: {}]   ;;  %s3363_s21 = inlined_call_operand.vmem [shape: f32[1,128], index: 21, kind: input, shape index: {}]   ;;  %s3364_s22 = inlined_call_operand.vmem [shape: f32[2,8,128], index: 22, kind: output, shape index: {}]  }
   0x1   :  { %3370 = sst [smem:[#allocation13_spill]] %s3342_s0 }
   0x2   :  { %3371 = sst [smem:[#allocation14_spill]] %s3343_s1 }
   0x3   :  { %3372 = sst [smem:[#allocation15_spill]] %s3344_s2 }
   0x4   :  { %3373 = sst [smem:[#allocation16_spill]] %s3345_s3 }
   0x5   :  { %3374 = sst [smem:[#allocation17_spill]] %s3346_s4 }
   0x6   :  { %3375 = sst [smem:[#allocation18_spill]] %s3347_s5 }
   0x7   :  { %3376 = sst [smem:[#allocation19_spill]] %s3348_s6 }
   0x8   :  { %3377 = sst [smem:[#allocation20_spill]] %s3361_s19 }
   0x9   :  { %3378 = sst [smem:[#allocation21_spill]] %s3362_s20 }
   0xa   :  { %3379 = sst [smem:[#allocation22_spill]] %s3363_s21 }
   0xb   :  { %3380 = sst [smem:[#allocation23_spill]] %s3364_s22 }
   0xc   :  { %27 = vsyncpa [#allocation3], 0 }
   0xd   :  { %28 = vsyncpa [#allocation5], 0 }
   0xe   :  { %29 = vsyncpa [#allocation8], 0  ;;  %s2877_s3 = smov 0  }
   0xf LB: > { %3381 = sst [smem:[#allocation12_spill]] %s2751_s3  ;;  %s2883_s28 = sadd.s32 4294967295, %s2751_s3   ;;  %s2751_s3 = sphi %s2877_s3, %s35_s3  }
  0x10   : > { %p2142_p0 = scmp.ge.s32.totalorder %s2751_s3, 1  ;;  %p538_p1 = scmp.lt.s32.totalorder %s2751_s3, 3 }
  0x11   : > { %p3368_p2 = scmp.eq.s32.totalorder %s2883_s28, 0  ;;  %s2753_s30 = smov [#allocation4]  }
  0x12   : > { %p2888_p3 = pnand %p2142_p0, %p538_p1  ;;  %s590_s4 = sshll.u32 %s2753_s30, 4  ;;  %s2892_s4 = int_to_ptr.vmem [resolvable:$true] %s590_s4 }
  0x13   : > { %s2754_s0 = smov [#allocation2]   ;;  %s2755_s5 = smov [#allocation6]  }
  0x14   : > { %s3382_s29 = scalar_select %p2888_p3, 1, 0 }
  0x15   : > { %p2473_p4 = pneg %p2888_p3  ;;  %s568_s23 = sshll.u32 %s2754_s0, 4  ;;  %s2896_s23 = int_to_ptr.vmem [resolvable:$true] %s568_s23 }
  0x16   : > { %s612_s24 = sshll.u32 %s2755_s5, 4  ;;  %s2756_s6 = smov [#allocation7]   ;;  %s2904_s24 = int_to_ptr.vmem [resolvable:$true] %s612_s24 }
  0x17   : > { %p2900_p5 = pnand %p3368_p2, %p2473_p4  ;;  %s2906_s25 = sshll.u32 %s2756_s6, 4  ;;  %s629_s25 = int_to_ptr.vmem [resolvable:$true] %s2906_s25 }
  0x18   : > { %s2621_s27 = scalar_lea.hbm %s3354_s12, 1024 }
  0x19   : > { %p2622_p6 = scmp.ne.s32.totalorder %s3354_s12, %s2621_s27  ;;  %p2916_p7 = pneg %p2900_p5 }
  0x1a   : > { %p2628_p10 = scmp.lt.u32.totalorder %s2621_s27, %s3354_s12 }
  0x1b   : > { %p2624_p8 = pnand %p2916_p7, %p2622_p6 }
  0x1d   : > { %p2625_p9 = pneg %p2624_p8 }
  0x1f   : > { %p2630_p11 = pnand %p2628_p10, %p2625_p9 }
  0x21   : > { %2633 = shalt.err (!%p2630_p11)
}
  0x22   : > { %s2634_s26 = scalar_lea.vmem %s2892_s4, 1024  ;;  %p2642_p1 = scmp.lt.s32.totalorder %s2892_s4, %s2892_s4 }
  0x23   : > { %p2635_p12 = scmp.ne.s32.totalorder %s2892_s4, %s2634_s26  ;;  %p2643_p4 = scmp.lt.s32.totalorder %s2634_s26, %s2634_s26 }
  0x25   : > { %p2637_p13 = pnand %p2635_p12, %p2916_p7  ;;  %p2644_p6 = por %p2643_p4, %p2642_p1 }
  0x27   : > { %p2638_p0 = pneg %p2637_p13 }
  0x29   : > { %p2645_p8 = pnand %p2644_p6, %p2638_p0 }
  0x2b   : > { %2648 = shalt.err (!%p2645_p8)
}
  0x2c   : > { %s2757_s2 = smov 64   ;;  %s2758_s27 = smov 4  }
  0x2d   : > { %2479 = dma.hbm_to_vmem [thread:$0]  (!%p2900_p5), %s3354_s12, 1024, %s2892_s4, [#allocation5], %s2757_s2, %s2757_s2, %s2758_s27  }
  0x2e   : > { %s2649_s26 = scalar_lea.hbm %s3350_s8, 1024 }
  0x2f   : > { %p2650_p9 = scmp.ne.s32.totalorder %s3350_s8, %s2649_s26  ;;  %p2656_p12 = scmp.lt.u32.totalorder %s2649_s26, %s3350_s8 }
  0x31   : > { %p2652_p10 = pnand %p2650_p9, %p2916_p7 }
  0x33   : > { %p2653_p11 = pneg %p2652_p10 }
  0x35   : > { %p2658_p13 = pnand %p2656_p12, %p2653_p11 }
  0x37   : > { %2661 = shalt.err (!%p2658_p13)
}
  0x38   : > { %s2662_s4 = scalar_lea.vmem %s2896_s23, 1024  ;;  %p2670_p6 = scmp.lt.s32.totalorder %s2896_s23, %s2896_s23 }
  0x39   : > { %p2663_p0 = scmp.ne.s32.totalorder %s2896_s23, %s2662_s4  ;;  %p2671_p8 = scmp.lt.s32.totalorder %s2662_s4, %s2662_s4 }
  0x3b   : > { %p2665_p1 = pnand %p2663_p0, %p2916_p7  ;;  %p2672_p9 = por %p2671_p8, %p2670_p6 }
  0x3d   : > { %p2666_p4 = pneg %p2665_p1 }
  0x3f   : > { %p2673_p10 = pnand %p2672_p9, %p2666_p4 }
  0x41   : > { %2676 = shalt.err (!%p2673_p10)
}
  0x42   : > { %2476 = dma.hbm_to_vmem [thread:$0]  (!%p2900_p5), %s3350_s8, 1024, %s2896_s23, [#allocation3], %s2757_s2, %s2757_s2, %s2758_s27  }
  0x43   : > { %s2677_s30 = scalar_lea.hbm %s3358_s16, 1024 }
  0x44   : > { %p2678_p11 = scmp.ne.s32.totalorder %s3358_s16, %s2677_s30  ;;  %p2684_p0 = scmp.lt.u32.totalorder %s2677_s30, %s3358_s16 }
  0x46   : > { %p2680_p12 = pnand %p2678_p11, %p2916_p7 }
  0x48   : > { %p2681_p13 = pneg %p2680_p12 }
  0x4a   : > { %p2686_p1 = pnand %p2684_p0, %p2681_p13 }
  0x4c   : > { %2689 = shalt.err (!%p2686_p1)
}
  0x4d   : > { %s2690_s23 = scalar_lea.vmem %s2904_s24, 1024  ;;  %p2698_p9 = scmp.lt.s32.totalorder %s2904_s24, %s2904_s24 }
  0x4e   : > { %p2691_p4 = scmp.ne.s32.totalorder %s2904_s24, %s2690_s23  ;;  %p2699_p10 = scmp.lt.s32.totalorder %s2690_s23, %s2690_s23 }
  0x50   : > { %p2693_p6 = pnand %p2691_p4, %p2916_p7  ;;  %p2700_p11 = por %p2699_p10, %p2698_p9 }
  0x52   : > { %p2694_p8 = pneg %p2693_p6 }
  0x54   : > { %p2701_p12 = pnand %p2700_p11, %p2694_p8 }
  0x56   : > { %2704 = shalt.err (!%p2701_p12)
}
  0x57   : > { %2482 = dma.hbm_to_vmem [thread:$0]  (!%p2900_p5), %s3358_s16, 1024, %s2904_s24, [#allocation5], %s2757_s2, %s2757_s2, %s2758_s27  }
  0x58   : > { %s2705_s22 = scalar_lea.hbm %s3360_s18, 1024 }
  0x59   : > { %p2706_p13 = scmp.ne.s32.totalorder %s3360_s18, %s2705_s22  ;;  %p2712_p4 = scmp.lt.u32.totalorder %s2705_s22, %s3360_s18 }
  0x5b   : > { %p2708_p0 = pnand %p2706_p13, %p2916_p7 }
  0x5d   : > { %p2709_p1 = pneg %p2708_p0 }
  0x5f   : > { %p2714_p6 = pnand %p2712_p4, %p2709_p1 }
  0x61   : > { %2717 = shalt.err (!%p2714_p6)
}
  0x62   : > { %s2718_s26 = scalar_lea.vmem %s629_s25, 1024  ;;  %p2726_p11 = scmp.lt.s32.totalorder %s629_s25, %s629_s25 }
  0x63   : > { %p2719_p8 = scmp.ne.s32.totalorder %s629_s25, %s2718_s26  ;;  %p2727_p12 = scmp.lt.s32.totalorder %s2718_s26, %s2718_s26 }
  0x65   : > { %p2721_p9 = pnand %p2719_p8, %p2916_p7  ;;  %p2728_p2 = por %p2727_p12, %p2726_p11 }
  0x67   : > { %p2722_p10 = pneg %p2721_p9 }
  0x69   : > { %p2729_p3 = pnand %p2728_p2, %p2722_p10 }
  0x6b   : > { %2732 = shalt.err (!%p2729_p3)
}
  0x6c   : > { %2485 = dma.hbm_to_vmem [thread:$0]  (!%p2900_p5), %s3360_s18, 1024, %s629_s25, [#allocation8], %s2757_s2, %s2757_s2, %s2758_s27  }
  0x6d   : > { %p3385_p13 = scmp.ne.s32.totalorder %s3382_s29, 0 }
  0x6e   : > { %p3386_p7 = scmp.eq.s32.totalorder (!%p3385_p13), %s2883_s28, 0 }
  0x6f   : > { %667 = sbr.rel (%p3385_p13) target bundleno = 3474 (0xd92), region = 108 }
  0x76   : > { %2738 = dma.done.wait (%p3386_p7), [#allocation3], 1024   ;;  %p3387_p0 = pmov %p3386_p7 }
  0x78   : > { %2740 = vsyncadd (%p3387_p0), [#allocation3], 4294966272  ;;  %p3388_p2 = pmov %p3387_p0 }
  0x79   : > { %p3389_p3 = pmov %p3387_p0 }
  0x7a   : > { %2742 = dma.done.wait (%p3388_p2), [#allocation5], 2048  }
  0x7b   : > { %2744 = vsyncadd (%p3389_p3), [#allocation5], 4294965248  ;;  %p3390_p1 = pmov %p3387_p0 }
  0x7c   : > { %p3391_p5 = pmov %p3387_p0 }
  0x7d   : > { %2746 = dma.done.wait (%p3390_p1), [#allocation8], 1024  }
  0x7e   : > { %2748 = vsyncadd (%p3391_p5), [#allocation8], 4294966272  ;;  %v2759_v0 = vmov 0   ;;  %s3392_s1 = sld [smem:[#allocation15_spill]]  ;;  %p743_p4 = scmp.lt.s32.totalorder %s2883_s28, 1  ;;  %v2760_v19 = vmov 0.0   ;;  %v793_v20 = vlaneseq }
  0x7f   : > { %968 = vmatprep.mubr.bf16.mxu0 %v2759_v0  ;;  %s3393_s24 = sld [smem:[#allocation13_spill]]  ;;  %2313 = vmatprep.subr.bf16.mxu1 %v2760_v19  ;;  %vm2761_vm0 = vmmov 0   ;;  %s3394_s4 = sld [smem:[#allocation16_spill]]  ;;  %vm1066_vm2 = vcmask 64512   ;;  %vm1083_vm3 = vcmask 1043456  }
  0x80   : > { %s3405_s28 = smov (!%p743_p4, %s2883_s28), 1  ;;  %2329 = vmatprep.mubr.msk.bf16.mxu1 %vm2761_vm0, %v2760_v19  ;;  %v3095_v21 = vshrl.u32 %v793_v20, 7  ;;  %v1063_v43 = vand.u32 127, %v793_v20  ;;  %s3396_s2 = sld [smem:[#allocation18_spill]] }
  0x81   : > { %s3055_s23 = sshll.u32 %s3405_s28, 3  ;;  %s3395_s28 = sld [smem:[#allocation17_spill]] }
  0x82   : > { %v799_v22 = vsub.s32 1, %v3095_v21  ;;  %v795_v25 = vsub.s32 0, %v3095_v21  ;;  %vm1064_vm1 = vcmp.ge.s32.totalorder %v3095_v21, %v1063_v43  ;;  %v803_v51 = vsub.s32 2, %v3095_v21  ;;  %v2571_v43 = vld [vmem:[%s3352_s10 + $0x54] ss:$8 sps:$4 sm:$0xff]   ;;  %s3397_s19 = sld [smem:[#allocation14_spill]] }
  0x83   : > { %s3398_s26 = sld [smem:[#allocation19_spill]]  ;;  %s3400_s25 = sld [smem:[#allocation21_spill]] }
  0x84   : > { %v2511_v1 = vld [vmem:[%s3392_s1 + $0x4] ss:$12 sps:$4 sm:$0xff]   ;;  %v2513_v2 = vld [vmem:[%s3392_s1] ss:$12 sps:$4 sm:$0xff]   ;;  %v2514_v3 = vld [vmem:[%s3392_s1 + $0x1c] ss:$12 sps:$4 sm:$0xff]  }
  0x85   : > { %936 = vmatprep.subr.bf16.mxu0 %v2511_v1  ;;  %v2516_v4 = vld [vmem:[%s3392_s1 + $0x18] ss:$12 sps:$4 sm:$0xff]   ;;  %v2517_v5 = vld [vmem:[%s3392_s1 + $0x34] ss:$12 sps:$4 sm:$0xff]   ;;  %v2519_v6 = vld [vmem:[%s3392_s1 + $0x30] ss:$12 sps:$4 sm:$0xff]   ;;  %s746_s3 = scalar_lea.vmem %s3393_s24, %s3055_s23 }
  0x86   : > { %937 = vmatpush1.bf16.msra.mxu0 %v2513_v2  ;;  %v2520_v7 = vld [vmem:[%s3392_s1 + $0x4c] ss:$12 sps:$4 sm:$0xff]   ;;  %v2522_v8 = vld [vmem:[%s3392_s1 + $0x48] ss:$12 sps:$4 sm:$0xff]   ;;  %v2523_v9 = vld [vmem:[%s3392_s1 + $0x64] ss:$12 sps:$4 sm:$0xff]  }
  0x87   : > { %938 = vmatprep.subr.bf16.mxu0 %v2514_v3  ;;  %v2525_v10 = vld [vmem:[%s3392_s1 + $0x60] ss:$12 sps:$4 sm:$0xff]   ;;  %v2526_v11 = vld [vmem:[%s3392_s1 + $0x7c] ss:$12 sps:$4 sm:$0xff]   ;;  %v2528_v12 = vld [vmem:[%s3392_s1 + $0x78] ss:$12 sps:$4 sm:$0xff]  }
  0x88   : > { %v2529_v13 = vld [vmem:[%s3392_s1 + $0x94] ss:$12 sps:$4 sm:$0xff]   ;;  %v2531_v14 = vld [vmem:[%s3392_s1 + $0x90] ss:$12 sps:$4 sm:$0xff]   ;;  %v2532_v15 = vld [vmem:[%s3392_s1 + $0xac] ss:$12 sps:$4 sm:$0xff]   ;;  %s750_s20 = scalar_lea.vmem %s3397_s19, %s3055_s23 }
  0x89   : > { %v2534_v16 = vld [vmem:[%s3392_s1 + $0xa8] ss:$12 sps:$4 sm:$0xff]   ;;  %v3085_v17 = vld [vmem:[%s746_s3] sm:$0xff]  ;;  %v2538_v38 = vld [vmem:[%s3392_s1 + $0x50] ss:$12 sps:$4 sm:$0xff]   ;;  %s3399_s24 = sld [smem:[#allocation20_spill]] }
  0x8a   : > { %939 = vmatpush1.bf16.msra.mxu0 %v2516_v4  ;;  %v791_v18 = vpack.c.bf16 %v3085_v17, %v3085_v17  ;;  %v790_v23 = vld [vmem:[%s3394_s4] sm:$0x7]  ;;  %v2535_v35 = vld [vmem:[%s3392_s1 + $0x8] ss:$12 sps:$4 sm:$0xff]   ;;  %v2537_v37 = vld [vmem:[%s3392_s1 + $0x38] ss:$12 sps:$4 sm:$0xff]  }
  0x8b   : > { %940 = vmatprep.subr.bf16.mxu0 %v2517_v5  ;;  %v800_v24 = vrot.slane %v790_v23, %v799_v22  ;;  %v796_v30 = vrot.slane %v790_v23, %v795_v25  ;;  %2314 = vmatpush3.bf16.msra.mxu1 %v2535_v35  ;;  %v2536_v36 = vld [vmem:[%s3392_s1 + $0x20] ss:$12 sps:$4 sm:$0xff]   ;;  %v2539_v39 = vld [vmem:[%s3392_s1 + $0x68] ss:$12 sps:$4 sm:$0xff]   ;;  %v2541_v41 = vld [vmem:[%s3392_s1 + $0x98] ss:$12 sps:$4 sm:$0xff]   ;;  %v804_v52 = vrot.slane %v790_v23, %v803_v51 }
  0x8c   : > { %2315 = vmatprep.subr.bf16.mxu1 %v2760_v19  ;;  %v2540_v40 = vld [vmem:[%s3392_s1 + $0x80] ss:$12 sps:$4 sm:$0xff]   ;;  %v2542_v42 = vld [vmem:[%s3392_s1 + $0xb0] ss:$12 sps:$4 sm:$0xff]   ;;  %s3401_s4 = sld [smem:[#allocation22_spill]]  ;;  %s3402_s21 = sld [smem:[#allocation23_spill]] }
  0x8d   : > { %v2543_v5 = vld [vmem:[%s3395_s28] sm:$0xff]  }
  0x8e   : > { %941 = vmatpush1.bf16.msra.mxu0 %v2519_v6  ;;  %v2551_v23 = vld [vmem:[%s3352_s10] ss:$8 sps:$4 sm:$0xff]  }
  0x8f   : > { %942 = vmatprep.subr.bf16.mxu0 %v2520_v7  ;;  %2316 = vmatpush3.bf16.msra.mxu1 %v2536_v36  ;;  %v2544_v7 = vld [vmem:[%s3395_s28 + $0x8] sm:$0xff]   ;;  %v757_v51 = vld [vmem:[%s750_s20] sm:$0xff] }
  0x90   : > { %2317 = vmatprep.subr.bf16.mxu1 %v2760_v19 }
  0x92   : > { %943 = vmatpush1.bf16.msra.mxu0 %v2522_v8  ;;  %v2545_v8 = vld [vmem:[%s3395_s28 + $0x10] sm:$0xff]   ;;  %s754_s22 = scalar_lea.vmem %s3402_s21, %s3055_s23 }
  0x93   : > { %944 = vmatprep.subr.bf16.mxu0 %v2523_v9  ;;  %2318 = vmatpush3.bf16.msra.mxu1 %v2537_v37  ;;  %v2546_v9 = vld [vmem:[%s3395_s28 + $0x18] sm:$0xff]   ;;  %v2560_v37 = vld [vmem:[#allocation2] sm:$0xff]  }
  0x94   : > { %2319 = vmatprep.subr.bf16.mxu1 %v2760_v19 }
  0x96   : > { %945 = vmatpush1.bf16.msra.mxu0 %v2525_v10  ;;  %v2547_v10 = vld [vmem:[%s3395_s28 + $0x20] sm:$0xff]  }
  0x97   : > { %946 = vmatprep.subr.bf16.mxu0 %v2526_v11  ;;  %2320 = vmatpush3.bf16.msra.mxu1 %v2538_v38  ;;  %v2548_v11 = vld [vmem:[%s3395_s28 + $0x28] sm:$0xff]   ;;  %v2563_v38 = vld [vmem:[%s3352_s10 + $0x34] ss:$8 sps:$4 sm:$0xff]  }
  0x98   : > { %2321 = vmatprep.subr.bf16.mxu1 %v2760_v19 }
  0x9a   : > { %947 = vmatpush1.bf16.msra.mxu0 %v2528_v12  ;;  %v2549_v12 = vld [vmem:[%s3395_s28 + $0x30] sm:$0xff]  }
  0x9b   : > { %948 = vmatprep.subr.bf16.mxu0 %v2529_v13  ;;  %2322 = vmatpush3.bf16.msra.mxu1 %v2539_v39  ;;  %v2550_v13 = vld [vmem:[%s3395_s28 + $0x38] sm:$0xff]  }
  0x9c   : > { %2323 = vmatprep.subr.bf16.mxu1 %v2760_v19  ;;  %v2561_v39 = vld [vmem:[%s3352_s10 + $0x30] ss:$8 sps:$4 sm:$0xff]  }
  0x9e   : > { %949 = vmatpush1.bf16.msra.mxu0 %v2531_v14 }
  0x9f   : > { %950 = vmatprep.subr.bf16.mxu0 %v2532_v15  ;;  %2324 = vmatpush3.bf16.msra.mxu1 %v2540_v40  ;;  %v2567_v40 = vld [vmem:[%s3352_s10 + $0x44] ss:$8 sps:$4 sm:$0xff]  }
  0xa0   : > { %2325 = vmatprep.subr.bf16.mxu1 %v2760_v19 }
  0xa2   : > { %951 = vmatpush1.bf16.msra.mxu0 %v2534_v16 }
  0xa3   : > { %2333 = vmatprep.subr.bf16.mxu0 %v2760_v19  ;;  %2326 = vmatpush3.bf16.msra.mxu1 %v2541_v41  ;;  %v2565_v41 = vld [vmem:[%s3352_s10 + $0x40] ss:$8 sps:$4 sm:$0xff]  }
  0xa4   : > { %2327 = vmatprep.subr.bf16.mxu1 %v2760_v19 }
  0xa5   : > { %969 = vmatmul.mubr.bf16.vlgmr.msra.gmra.mrb[0].mxu0 %v791_v18 }
  0xa6   : > { %2335 = vmatprep.mubr.msk.bf16.mxu0 %vm2761_vm0, %v2760_v19 }
  0xa7   : > { %2328 = vmatpush3.bf16.msra.mxu1 %v2542_v42  ;;  %v2568_v42 = vld [vmem:[#allocation2 + $0x10] sm:$0xff]  }
  0xa8   : > { %2365 = vmatprep.subr.bf16.mxu1 %v2760_v19 }
  0xaa   : > { %2330 = vmatmul.mubr.bf16.vlgmr.msra.gmra.mrb[0].mxu1 %v791_v18 }
  0xab   : > { %2381 = vmatprep.mubr.msk.bf16.mxu1 %vm2761_vm0, %v2760_v19  ;;  %2366 = vmatpush3.bf16.msra.mxu1 %v2560_v37 }
  0xac   : > { %2367 = vmatprep.subr.bf16.mxu1 %v2760_v19 }
 0x178   : > { %v970_v26 = vpop.f32.mrb[0].mxu0 }
 0x179   : > { %v972_v27 = vpop.f32.mrb[1].mxu0  ;;  %v971_v33 = vadd.f32 %v970_v26, %v796_v30  ;;  %v2556_v26 = vld [vmem:[%s3352_s10 + $0x14] ss:$8 sps:$4 sm:$0xff]  }
 0x17a   : > { %v973_v28 = vadd.f32 %v972_v27, %v800_v24  ;;  %v974_v29 = vpop.f32.mrb[2].mxu0  ;;  %v2553_v24 = vld [vmem:[%s3352_s10 + $0x4] ss:$8 sps:$4 sm:$0xff]   ;;  %v2554_v27 = vld [vmem:[%s3352_s10 + $0x10] ss:$8 sps:$4 sm:$0xff]  }
 0x17b   : > { %v975_v31 = vpop.f32.mrb[3].mxu0  ;;  %v1017_v34 = vpack.c.bf16 %v971_v33, %v971_v33  ;;  %v2181_v29 = vld [vmem:[%s3396_s2] ss:$0 sm:$0xff] }
 0x17c   : > { %v1018_v32 = vpack.c.bf16 %v973_v28, %v973_v28  ;;  %v2557_v28 = vld [vmem:[%s3352_s10 + $0x20] ss:$8 sps:$4 sm:$0xff]  }
 0x17d   : > { %v1011_v53 = vpop.f32.mrb[0].mxu1 }
 0x17e   : > { %2334 = vmatpush3.bf16.xpose.msra.mxu0 %v1018_v32  ;;  %v1012_v54 = vadd.f32 %v1011_v53, %v804_v52  ;;  %v2331_v55 = vpop.f32.mrb[1].mxu1  ;;  %v2580_v52 = vld [vmem:[#allocation2 + $0x28] sm:$0xff]   ;;  %v1399_v53 = vpack.c.bf16 %v757_v51, %v757_v51 }
 0x17f   : > { %2339 = vmatprep.subr.bf16.mxu0 %v2760_v19  ;;  %v1014_v56 = vpop.f32.mrb[2].mxu1  ;;  %v2582_v55 = vld [vmem:[#allocation2 + $0x38] sm:$0xff]  }
 0x180   : > { %v1079_v57 = vpack.c.bf16 %v1012_v54, %v1012_v54  ;;  %v2332_v58 = vpop.f32.mrb[3].mxu1  ;;  %v2581_v54 = vld [vmem:[#allocation2 + $0x30] sm:$0xff]  }
 0x182   : > { %v1085_v59 = vsel %vm1083_vm3, %v1079_v57, 0 }
 0x185   : > { %2336 = vmatmul.mubr.bf16.vlgmr.msra.gmra.mrb[4].mxu0 %v1017_v34 }
 0x186   : > { %2341 = vmatprep.mubr.msk.bf16.mxu0 %vm2761_vm0, %v2760_v19  ;;  %2340 = vmatpush3.bf16.msra.mxu0 %v1085_v59 }
 0x187   : > { %2345 = vmatprep.subr.bf16.mxu0 %v2760_v19 }
 0x258   : > { %v1053_v44 = vpop.f32.mrb[4].mxu0 }
 0x259   : > { %v1059_v45 = vmul.f32 0.17677669, %v1053_v44  ;;  %v2337_v46 = vpop.f32.mrb[5].mxu0  ;;  %v2569_v44 = vld [vmem:[%s3352_s10 + $0x50] ss:$8 sps:$4 sm:$0xff]  }
 0x25a   : > { %v1056_v47 = vpop.f32.mrb[6].mxu0  ;;  %v2575_v46 = vld [vmem:[%s3352_s10 + $0x64] ss:$8 sps:$4 sm:$0xff]  }
 0x25b   : > { %v2338_v48 = vpop.f32.mrb[7].mxu0  ;;  %v1065_v49 = vsel %vm1064_vm1, %v1059_v45, -1e+30  ;;  %v2572_v45 = vld [vmem:[#allocation2 + $0x18] sm:$0xff]   ;;  %v2573_v47 = vld [vmem:[%s3352_s10 + $0x60] ss:$8 sps:$4 sm:$0xff]  }
 0x25c   : > { %v1067_v50 = vsel %vm1066_vm2, %v1065_v49, -inf  ;;  %v2576_v48 = vld [vmem:[#allocation2 + $0x20] sm:$0xff]  }
 0x25d   : > { %1068 = vmax.xlane.f32.xlu0 %v1067_v50  ;;  %v2577_v50 = vld [vmem:[%s3352_s10 + $0x70] ss:$8 sps:$4 sm:$0xff]  }
 0x2ea   : > { %v1069_v60 = vpop.xlane.xlu0 %1068 }
 0x2eb   : > { %v1070_v61 = vsub.f32 %v1065_v49, %v1069_v60  ;;  %v2579_v49 = vld [vmem:[%s3352_s10 + $0x74] ss:$8 sps:$4 sm:$0xff]  }
 0x2ed   : > { %v1071_v62 = vmul.f32 1.442695, %v1070_v61 }
 0x2ef   : > { %2607 = vpow2.f32 %v1071_v62 }
 0x2f9   : > { %v2608_v63 = vpop.eup %2607 }
 0x2fa   : > { %v1073_v1 = vsel %vm1066_vm2, %v2608_v63, 0.0 }
 0x2fb   : > { %1074 = vadd.xlane.f32.xlu0 %v1073_v1 }
 0x388   : > { %v1075_v2 = vpop.xlane.xlu0 %1074 }
 0x389   : > { %2609 = vrcp.f32 %v1075_v2 }
 0x393   : > { %v2610_v3 = vpop.eup %2609 }
 0x394   : > { %v1077_v4 = vmul.f32 %v2610_v3, %v2608_v63  ;;  %v2190_v3 = vld [vmem:[%s3398_s26] ss:$0 sm:$0xff] }
 0x396   : > { %v1078_v6 = vpack.c.bf16 %v1077_v4, %v1077_v4 }
 0x398   : > { %2342 = vmatmul.mubr.msk.bf16.vlgmr.msra.gmra.mrb[8].mxu0 %vm1066_vm2, %v1078_v6 }
 0x399   : > { %2346 = vmatpush3.bf16.msra.mxu0 %v2543_v5  ;;  %2361 = vmatprep.mubr.msk.bf16.mxu0 %vm2761_vm0, %v2760_v19  ;;  %v2191_v5 = vld [vmem:[%s3349_s7] ss:$0 sm:$0xff] }
 0x39a   : > { %2347 = vmatprep.subr.bf16.mxu0 %v2760_v19 }
 0x39d   : > { %2348 = vmatpush3.bf16.msra.mxu0 %v2544_v7 }
 0x39e   : > { %2349 = vmatprep.subr.bf16.mxu0 %v2760_v19 }
 0x3a1   : > { %2350 = vmatpush3.bf16.msra.mxu0 %v2545_v8 }
 0x3a2   : > { %2351 = vmatprep.subr.bf16.mxu0 %v2760_v19 }
 0x3a5   : > { %2352 = vmatpush3.bf16.msra.mxu0 %v2546_v9  ;;  %v1398_v9 = vld [vmem:[%s3353_s11] sm:$0x3] }
 0x3a6   : > { %2353 = vmatprep.subr.bf16.mxu0 %v2760_v19 }
 0x3a9   : > { %2354 = vmatpush3.bf16.msra.mxu0 %v2547_v10  ;;  %v1404_v10 = vrot.slane %v1398_v9, %v795_v25 }
 0x3aa   : > { %2355 = vmatprep.subr.bf16.mxu0 %v2760_v19 }
 0x3ad   : > { %2356 = vmatpush3.bf16.msra.mxu0 %v2548_v11 }
 0x3ae   : > { %2357 = vmatprep.subr.bf16.mxu0 %v2760_v19 }
 0x3b1   : > { %2358 = vmatpush3.bf16.msra.mxu0 %v2549_v12 }
 0x3b2   : > { %2359 = vmatprep.subr.bf16.mxu0 %v2760_v19 }
 0x3b5   : > { %2360 = vmatpush3.bf16.msra.mxu0 %v2550_v13 }
 0x3b6   : > { %1491 = vmatprep.subr.bf16.mxu0 %v2553_v24 }
 0x46b   : > { %v1121_v14 = vpop.f32.mrb[8].mxu0 }
 0x46c   : > { %v1144_v15 = vpack.c.bf16 %v1121_v14, %v1121_v14  ;;  %v2343_v16 = vpop.f32.mrb[9].mxu0 }
 0x46d   : > { %v1124_v18 = vpop.f32.mrb[10].mxu0 }
 0x46e   : > { %v2344_v20 = vpop.f32.mrb[11].mxu0  ;;  %2362 = vmatmul.mubr.bf16.vlgmr.msra.gmra.mrb[12].mxu0 %v1144_v15  ;;  %v1408_v18 = vrot.slane %v1398_v9, %v799_v22  ;;  %v2599_v9 = vld [vmem:[#allocation7] sm:$0xff]  }
 0x46f   : > { %1523 = vmatprep.mubr.bf16.mxu0 %v2759_v0  ;;  %1492 = vmatpush1.bf16.msra.mxu0 %v2551_v23  ;;  %v2559_v0 = vld [vmem:[%s3352_s10 + $0x24] ss:$8 sps:$4 sm:$0xff]   ;;  %v2192_v23 = vld [vmem:[%s3351_s9] ss:$0 sm:$0xff] }
 0x470   : > { %1493 = vmatprep.subr.bf16.mxu0 %v2556_v26 }
 0x473   : > { %1494 = vmatpush1.bf16.msra.mxu0 %v2554_v27 }
 0x474   : > { %1495 = vmatprep.subr.bf16.mxu0 %v2559_v0 }
 0x477   : > { %1496 = vmatpush1.bf16.msra.mxu0 %v2557_v28 }
 0x478   : > { %1497 = vmatprep.subr.bf16.mxu0 %v2563_v38 }
 0x47b   : > { %1498 = vmatpush1.bf16.msra.mxu0 %v2561_v39 }
 0x47c   : > { %1499 = vmatprep.subr.bf16.mxu0 %v2567_v40 }
 0x47f   : > { %1500 = vmatpush1.bf16.msra.mxu0 %v2565_v41 }
 0x480   : > { %1501 = vmatprep.subr.bf16.mxu0 %v2571_v43 }
 0x483   : > { %1502 = vmatpush1.bf16.msra.mxu0 %v2569_v44  ;;  %v2584_v44 = vld [vmem:[#allocation4 + $0x8] sm:$0xff]  }
 0x484   : > { %1503 = vmatprep.subr.bf16.mxu0 %v2575_v46  ;;  %v2586_v46 = vld [vmem:[#allocation4 + $0x18] sm:$0xff]  }
 0x487   : > { %1504 = vmatpush1.bf16.msra.mxu0 %v2573_v47  ;;  %v2587_v47 = vld [vmem:[#allocation4 + $0x20] sm:$0xff]  }
 0x488   : > { %1505 = vmatprep.subr.bf16.mxu0 %v2579_v49  ;;  %v2589_v49 = vld [vmem:[#allocation4 + $0x30] sm:$0xff]  }
 0x48b   : > { %1506 = vmatpush1.bf16.msra.mxu0 %v2577_v50  ;;  %v2590_v50 = vld [vmem:[#allocation4 + $0x38] sm:$0xff]  }
 0x48c   : > { %2417 = vmatprep.subr.bf16.mxu0 %v2760_v19 }
 0x48e   : > { %1524 = vmatmul.mubr.bf16.vlgmr.msra.gmra.mrb[16].mxu0 %v1399_v53 }
 0x48f   : > { %2433 = vmatprep.mubr.msk.bf16.mxu0 %vm2761_vm0, %v2760_v19 }
 0x541   : > { %v1233_v30 = vpop.f32.mrb[12].mxu0 }
 0x542   : > { %v1234_v31 = vadd.f32 %v2181_v29, %v1233_v30  ;;  %v2363_v32 = vpop.f32.mrb[13].mxu0 }
 0x543   : > { %v1236_v33 = vpop.f32.mrb[14].mxu0 }
 0x544   : > { %v3206_v34 = vadd.f32 %v1234_v31, %v3085_v17  ;;  %v2364_v35 = vpop.f32.mrb[15].mxu0  ;;  %v2564_v17 = vld [vmem:[#allocation2 + $0x8] sm:$0xff]  }
 0x545   : > { %2368 = vmatpush3.bf16.msra.mxu1 %v2564_v17 }
 0x546   : > { %1242 = vadd.xlane.f32.xlu1 %v3206_v34  ;;  %v1245_v36 = vmul.f32 %v3206_v34, %v3206_v34  ;;  %2369 = vmatprep.subr.bf16.mxu1 %v2760_v19 }
 0x549   : > { %2370 = vmatpush3.bf16.msra.mxu1 %v2568_v42  ;;  %v2583_v42 = vld [vmem:[#allocation4] sm:$0xff]  }
 0x54a   : > { %1246 = vadd.xlane.f32.xlu1 %v1245_v36  ;;  %2371 = vmatprep.subr.bf16.mxu1 %v2760_v19 }
 0x54d   : > { %2372 = vmatpush3.bf16.msra.mxu1 %v2572_v45  ;;  %v2585_v45 = vld [vmem:[#allocation4 + $0x10] sm:$0xff]  }
 0x54e   : > { %2373 = vmatprep.subr.bf16.mxu1 %v2760_v19 }
 0x551   : > { %2374 = vmatpush3.bf16.msra.mxu1 %v2576_v48  ;;  %v2588_v48 = vld [vmem:[#allocation4 + $0x28] sm:$0xff]  }
 0x552   : > { %2375 = vmatprep.subr.bf16.mxu1 %v2760_v19 }
 0x555   : > { %2376 = vmatpush3.bf16.msra.mxu1 %v2580_v52 }
 0x556   : > { %2377 = vmatprep.subr.bf16.mxu1 %v2760_v19 }
 0x559   : > { %2378 = vmatpush3.bf16.msra.mxu1 %v2581_v54 }
 0x55a   : > { %2379 = vmatprep.subr.bf16.mxu1 %v2760_v19 }
 0x55d   : > { %2380 = vmatpush3.bf16.msra.mxu1 %v2582_v55 }
 0x55e   : > { %2385 = vmatprep.subr.bf16.mxu1 %v2760_v19 }
 0x561   : > { %v1525_v11 = vpop.f32.mrb[16].mxu0 }
 0x562   : > { %v1526_v12 = vadd.f32 %v1525_v11, %v1404_v10  ;;  %v1527_v13 = vpop.f32.mrb[17].mxu0  ;;  %v2600_v10 = vld [vmem:[#allocation7 + $0x8] sm:$0xff]   ;;  %v2601_v11 = vld [vmem:[#allocation7 + $0x10] sm:$0xff]  }
 0x563   : > { %v1529_v14 = vpop.f32.mrb[18].mxu0  ;;  %v1528_v20 = vadd.f32 %v1527_v13, %v1408_v18  ;;  %v2603_v13 = vld [vmem:[#allocation7 + $0x20] sm:$0xff]  }
 0x564   : > { %v1533_v15 = vpack.c.bf16 %v1526_v12, %v1526_v12  ;;  %v1530_v16 = vpop.f32.mrb[19].mxu0  ;;  %v2602_v12 = vld [vmem:[#allocation7 + $0x18] sm:$0xff]   ;;  %v2604_v14 = vld [vmem:[#allocation7 + $0x28] sm:$0xff]  }
 0x565   : > { %v1587_v26 = vpack.c.bf16 %v1528_v20, %v1528_v20 }
 0x567   : > { %v1592_v30 = vsel %vm1083_vm3, %v1587_v26, 0 }
 0x5d3   : > { %v1243_v56 = vpop.xlane.xlu1 %1242 }
 0x5d4   : > { %v1244_v57 = vmul.f32 0.03125, %v1243_v56  ;;  %v2591_v56 = vld [vmem:[#allocation6] sm:$0xff]  }
 0x5d5   : > { %2418 = vmatpush3.bf16.msra.mxu0 %v2591_v56 }
 0x5d6   : > { %v1249_v59 = vmul.f32 %v1244_v57, %v1244_v57  ;;  %v1252_v1 = vsub.f32 %v3206_v34, %v1244_v57  ;;  %2419 = vmatprep.subr.bf16.mxu0 %v2760_v19  ;;  %v2218_v57 = vld [vmem:[%s3355_s13] ss:$0 sm:$0xff] }
 0x5d7   : > { %v1247_v58 = vpop.xlane.xlu1 %1246 }
 0x5d8   : > { %v1248_v60 = vmul.f32 0.03125, %v1247_v58 }
 0x5da   : > { %v1250_v61 = vsub.f32 %v1248_v60, %v1249_v59 }
 0x5dc   : > { %v1251_v62 = vmax.f32 %v1250_v61, 0.0 }
 0x5de   : > { %v1253_v63 = vadd.f32 1e-05, %v1251_v62 }
 0x5e0   : > { %2611 = vrsqrt.f32 %v1253_v63 }
 0x5ea   : > { %v2612_v2 = vpop.eup %2611 }
 0x5eb   : > { %v1255_v4 = vmul.f32 %v2612_v2, %v1252_v1  ;;  %v2592_v2 = vld [vmem:[#allocation6 + $0x8] sm:$0xff]  }
 0x5ec   : > { %2420 = vmatpush3.bf16.msra.mxu0 %v2592_v2 }
 0x5ed   : > { %v1262_v6 = vmul.f32 %v2190_v3, %v1255_v4  ;;  %2421 = vmatprep.subr.bf16.mxu0 %v2760_v19  ;;  %v2593_v3 = vld [vmem:[#allocation6 + $0x10] sm:$0xff]   ;;  %v2594_v4 = vld [vmem:[#allocation6 + $0x18] sm:$0xff]  }
 0x5ef   : > { %v3263_v7 = vadd.f32 %v2191_v5, %v1262_v6  ;;  %v2595_v5 = vld [vmem:[#allocation6 + $0x20] sm:$0xff]   ;;  %v2596_v6 = vld [vmem:[#allocation6 + $0x28] sm:$0xff]  }
 0x5f0   : > { %2422 = vmatpush3.bf16.msra.mxu0 %v2593_v3 }
 0x5f1   : > { %v1287_v8 = vpack.c.bf16 %v3263_v7, %v3263_v7  ;;  %2423 = vmatprep.subr.bf16.mxu0 %v2760_v19 }
 0x5f3   : > { %2382 = vmatmul.mubr.bf16.vlgmr.msra.gmra.mrb[4].mxu1 %v1287_v8  ;;  %v2598_v8 = vld [vmem:[#allocation6 + $0x38] sm:$0xff]  }
 0x5f4   : > { %2387 = vmatprep.mubr.msk.bf16.mxu1 %vm2761_vm0, %v2760_v19  ;;  %2386 = vmatpush3.bf16.xpose.msra.mxu1 %v1533_v15 }
 0x5f5   : > { %2391 = vmatprep.subr.bf16.mxu1 %v2760_v19  ;;  %2424 = vmatpush3.bf16.msra.mxu0 %v2594_v4 }
 0x5f6   : > { %2425 = vmatprep.subr.bf16.mxu0 %v2760_v19 }
 0x5f9   : > { %2426 = vmatpush3.bf16.msra.mxu0 %v2595_v5 }
 0x5fa   : > { %2427 = vmatprep.subr.bf16.mxu0 %v2760_v19 }
 0x5fd   : > { %2428 = vmatpush3.bf16.msra.mxu0 %v2596_v6 }
 0x5fe   : > { %2429 = vmatprep.subr.bf16.mxu0 %v2760_v19 }
 0x6c6   : > { %v1376_v24 = vpop.f32.mrb[4].mxu1 }
 0x6c7   : > { %v1377_v25 = vadd.f32 %v2192_v23, %v1376_v24  ;;  %v2383_v27 = vpop.f32.mrb[5].mxu1 }
 0x6c8   : > { %v1379_v0 = vpop.f32.mrb[6].mxu1 }
 0x6c9   : > { %v1532_v28 = vpack.c.bf16 %v1377_v25, %v1377_v25  ;;  %v2384_v29 = vpop.f32.mrb[7].mxu1 }
 0x6cb   : > { %2388 = vmatmul.mubr.bf16.vlgmr.msra.gmra.mrb[8].mxu1 %v1532_v28  ;;  %v2227_v28 = vld [vmem:[%s3356_s14] ss:$0 sm:$0xff] }
 0x6cc   : > { %2392 = vmatpush3.bf16.msra.mxu1 %v1592_v30  ;;  %2393 = vmatprep.mubr.msk.bf16.mxu1 %vm2761_vm0, %v2760_v19  ;;  %v2228_v30 = vld [vmem:[%s3357_s15] ss:$0 sm:$0xff] }
 0x6cd   : > { %2397 = vmatprep.subr.bf16.mxu1 %v2760_v19 }
 0x79e   : > { %v1568_v21 = vpop.f32.mrb[8].mxu1 }
 0x79f   : > { %v1574_v22 = vmul.f32 0.17677669, %v1568_v21  ;;  %v2389_v31 = vpop.f32.mrb[9].mxu1 }
 0x7a0   : > { %v1571_v32 = vpop.f32.mrb[10].mxu1 }
 0x7a1   : > { %v2390_v33 = vpop.f32.mrb[11].mxu1  ;;  %v1575_v34 = vsel %vm1066_vm2, %v1574_v22, -inf  ;;  %v2605_v32 = vld [vmem:[#allocation7 + $0x30] sm:$0xff]  }
 0x7a2   : > { %1576 = vmax.xlane.f32.xlu0 %v1575_v34  ;;  %v2606_v33 = vld [vmem:[#allocation7 + $0x38] sm:$0xff]   ;;  %v2229_v34 = vld [vmem:[%s3359_s17] ss:$0 sm:$0xff] }
 0x82f   : > { %v1577_v35 = vpop.xlane.xlu0 %1576 }
 0x830   : > { %v1578_v36 = vsub.f32 %v1574_v22, %v1577_v35 }
 0x832   : > { %v1579_v37 = vmul.f32 1.442695, %v1578_v36 }
 0x834   : > { %2613 = vpow2.f32 %v1579_v37 }
 0x83e   : > { %v2614_v38 = vpop.eup %2613 }
 0x83f   : > { %v1581_v39 = vsel %vm1066_vm2, %v2614_v38, 0.0 }
 0x840   : > { %1582 = vadd.xlane.f32.xlu1 %v1581_v39 }
 0x8cd   : > { %v1583_v17 = vpop.xlane.xlu1 %1582 }
 0x8ce   : > { %2615 = vrcp.f32 %v1583_v17 }
 0x8d8   : > { %v2616_v40 = vpop.eup %2615 }
 0x8d9   : > { %v1585_v41 = vmul.f32 %v2616_v40, %v2614_v38 }
 0x8db   : > { %v1586_v43 = vpack.c.bf16 %v1585_v41, %v1585_v41  ;;  %v2238_v41 = vld [vmem:[%s3399_s24] ss:$0 sm:$0xff] }
 0x8dd   : > { %2394 = vmatmul.mubr.msk.bf16.vlgmr.msra.gmra.mrb[12].mxu1 %vm1066_vm2, %v1586_v43 }
 0x8de   : > { %2398 = vmatpush3.bf16.msra.mxu1 %v2583_v42  ;;  %2413 = vmatprep.mubr.msk.bf16.mxu1 %vm2761_vm0, %v2760_v19 }
 0x8df   : > { %2399 = vmatprep.subr.bf16.mxu1 %v2760_v19 }
 0x8e2   : > { %2400 = vmatpush3.bf16.msra.mxu1 %v2584_v44 }
 0x8e3   : > { %2401 = vmatprep.subr.bf16.mxu1 %v2760_v19 }
 0x8e6   : > { %2402 = vmatpush3.bf16.msra.mxu1 %v2585_v45 }
 0x8e7   : > { %2403 = vmatprep.subr.bf16.mxu1 %v2760_v19 }
 0x8ea   : > { %2404 = vmatpush3.bf16.msra.mxu1 %v2586_v46 }
 0x8eb   : > { %2405 = vmatprep.subr.bf16.mxu1 %v2760_v19 }
 0x8ee   : > { %2406 = vmatpush3.bf16.msra.mxu1 %v2587_v47 }
 0x8ef   : > { %2407 = vmatprep.subr.bf16.mxu1 %v2760_v19 }
 0x8f2   : > { %2408 = vmatpush3.bf16.msra.mxu1 %v2588_v48 }
 0x8f3   : > { %2409 = vmatprep.subr.bf16.mxu1 %v2760_v19 }
 0x8f6   : > { %2410 = vmatpush3.bf16.msra.mxu1 %v2589_v49 }
 0x8f7   : > { %2411 = vmatprep.subr.bf16.mxu1 %v2760_v19 }
 0x8fa   : > { %2412 = vmatpush3.bf16.msra.mxu1 %v2590_v50 }
 0x8fb   : > { %2437 = vmatprep.subr.bf16.mxu1 %v2760_v19 }
 0x9b0   : > { %v1628_v51 = vpop.f32.mrb[12].mxu1 }
 0x9b1   : > { %v1651_v52 = vpack.c.bf16 %v1628_v51, %v1628_v51  ;;  %v2395_v53 = vpop.f32.mrb[13].mxu1 }
 0x9b2   : > { %v1631_v54 = vpop.f32.mrb[14].mxu1 }
 0x9b3   : > { %v2396_v55 = vpop.f32.mrb[15].mxu1  ;;  %2414 = vmatmul.mubr.bf16.vlgmr.msra.gmra.mrb[16].mxu1 %v1651_v52 }
 0x9b4   : > { %2453 = vmatprep.mubr.msk.bf16.mxu1 %vm2761_vm0, %v2760_v19  ;;  %2438 = vmatpush3.bf16.msra.mxu1 %v2599_v9 }
 0x9b5   : > { %2439 = vmatprep.subr.bf16.mxu1 %v2760_v19 }
 0x9b8   : > { %2440 = vmatpush3.bf16.msra.mxu1 %v2600_v10 }
 0x9b9   : > { %2441 = vmatprep.subr.bf16.mxu1 %v2760_v19 }
 0x9bc   : > { %2442 = vmatpush3.bf16.msra.mxu1 %v2601_v11 }
 0x9bd   : > { %2443 = vmatprep.subr.bf16.mxu1 %v2760_v19 }
 0x9c0   : > { %2444 = vmatpush3.bf16.msra.mxu1 %v2602_v12 }
 0x9c1   : > { %2445 = vmatprep.subr.bf16.mxu1 %v2760_v19 }
 0x9c4   : > { %2446 = vmatpush3.bf16.msra.mxu1 %v2603_v13 }
 0x9c5   : > { %2447 = vmatprep.subr.bf16.mxu1 %v2760_v19 }
 0x9c8   : > { %2448 = vmatpush3.bf16.msra.mxu1 %v2604_v14 }
 0x9c9   : > { %2449 = vmatprep.subr.bf16.mxu1 %v2760_v19 }
 0x9cc   : > { %2450 = vmatpush3.bf16.msra.mxu1 %v2605_v32 }
 0x9cd   : > { %2451 = vmatprep.subr.bf16.mxu1 %v2760_v19 }
 0x9d0   : > { %2452 = vmatpush3.bf16.msra.mxu1 %v2606_v33 }
 0xa86   : > { %v1740_v58 = vpop.f32.mrb[16].mxu1 }
 0xa87   : > { %v1741_v59 = vadd.f32 %v2218_v57, %v1740_v58  ;;  %v2415_v60 = vpop.f32.mrb[17].mxu1  ;;  %v2247_v58 = vld [vmem:[%s3400_s25] ss:$0 sm:$0xff] }
 0xa88   : > { %v1743_v61 = vpop.f32.mrb[18].mxu1  ;;  %v2248_v60 = vld [vmem:[%s3401_s4] ss:$0 sm:$0xff] }
 0xa89   : > { %v1748_v62 = vadd.f32 %v1741_v59, %v3263_v7  ;;  %v2416_v63 = vpop.f32.mrb[19].mxu1  ;;  %v2597_v7 = vld [vmem:[#allocation6 + $0x30] sm:$0xff]  }
 0xa8a   : > { %2430 = vmatpush3.bf16.msra.mxu0 %v2597_v7 }
 0xa8b   : > { %1749 = vadd.xlane.f32.xlu0 %v1748_v62  ;;  %v1752_v1 = vmul.f32 %v1748_v62, %v1748_v62  ;;  %2431 = vmatprep.subr.bf16.mxu0 %v2760_v19 }
 0xa8d   : > { %1753 = vadd.xlane.f32.xlu1 %v1752_v1 }
 0xa8e   : > { %2432 = vmatpush3.bf16.msra.mxu0 %v2598_v8 }
 0xb18   : > { %v1750_v15 = vpop.xlane.xlu0 %1749 }
 0xb19   : > { %v1751_v16 = vmul.f32 0.03125, %v1750_v15 }
 0xb1a   : > { %v1754_v18 = vpop.xlane.xlu1 %1753 }
 0xb1b   : > { %v1756_v20 = vmul.f32 %v1751_v16, %v1751_v16  ;;  %v1755_v23 = vmul.f32 0.03125, %v1754_v18  ;;  %v1759_v27 = vsub.f32 %v1748_v62, %v1751_v16 }
 0xb1d   : > { %v1757_v24 = vsub.f32 %v1755_v23, %v1756_v20 }
 0xb1f   : > { %v1758_v26 = vmax.f32 %v1757_v24, 0.0 }
 0xb21   : > { %v1760_v25 = vadd.f32 1e-05, %v1758_v26 }
 0xb23   : > { %2617 = vrsqrt.f32 %v1760_v25 }
 0xb2d   : > { %v2618_v0 = vpop.eup %2617 }
 0xb2e   : > { %v1762_v29 = vmul.f32 %v2618_v0, %v1759_v27 }
 0xb30   : > { %v1769_v21 = vmul.f32 %v2227_v28, %v1762_v29 }
 0xb32   : > { %v1776_v22 = vadd.f32 %v2228_v30, %v1769_v21 }
 0xb34   : > { %v1794_v31 = vpack.c.bf16 %v1776_v22, %v1776_v22 }
 0xb36   : > { %2434 = vmatmul.mubr.bf16.vlgmr.msra.gmra.mrb[20].mxu0 %v1794_v31 }
 0xc09   : > { %v1883_v35 = vpop.f32.mrb[20].mxu0 }
 0xc0a   : > { %v1884_v36 = vadd.f32 %v2229_v34, %v1883_v35  ;;  %v2435_v37 = vpop.f32.mrb[21].mxu0 }
 0xc0b   : > { %v1886_v38 = vpop.f32.mrb[22].mxu0 }
 0xc0c   : > { %v1889_v39 = vmax.f32 %v1884_v36, 0.0  ;;  %v2436_v17 = vpop.f32.mrb[23].mxu0 }
 0xc0e   : > { %v1907_v40 = vpack.c.bf16 %v1889_v39, %v1889_v39 }
 0xc10   : > { %2454 = vmatmul.mubr.bf16.vlgmr.msra.gmra.mrb[20].mxu1 %v1907_v40 }
 0xce3   : > { %v1996_v42 = vpop.f32.mrb[20].mxu1 }
 0xce4   : > { %v1997_v19 = vadd.f32 %v2238_v41, %v1996_v42  ;;  %v2455_v43 = vpop.f32.mrb[21].mxu1 }
 0xce5   : > { %v1999_v44 = vpop.f32.mrb[22].mxu1 }
 0xce6   : > { %v2004_v45 = vadd.f32 %v1997_v19, %v1776_v22  ;;  %v2456_v46 = vpop.f32.mrb[23].mxu1 }
 0xce8   : > { %2005 = vadd.xlane.f32.xlu0 %v2004_v45  ;;  %v2008_v47 = vmul.f32 %v2004_v45, %v2004_v45 }
 0xcea   : > { %2009 = vadd.xlane.f32.xlu1 %v2008_v47 }
 0xd75   : > { %v2006_v48 = vpop.xlane.xlu0 %2005 }
 0xd76   : > { %v2007_v49 = vmul.f32 0.03125, %v2006_v48 }
 0xd77   : > { %v2010_v50 = vpop.xlane.xlu1 %2009 }
 0xd78   : > { %v2012_v51 = vmul.f32 %v2007_v49, %v2007_v49  ;;  %v2011_v52 = vmul.f32 0.03125, %v2010_v50  ;;  %v2015_v56 = vsub.f32 %v2004_v45, %v2007_v49 }
 0xd7a   : > { %v2013_v53 = vsub.f32 %v2011_v52, %v2012_v51 }
 0xd7c   : > { %v2014_v54 = vmax.f32 %v2013_v53, 0.0 }
 0xd7e   : > { %v2016_v55 = vadd.f32 1e-05, %v2014_v54 }
 0xd80   : > { %2619 = vrsqrt.f32 %v2016_v55 }
 0xd8a   : > { %v2620_v57 = vpop.eup %2619 }
 0xd8b   : > { %v2018_v59 = vmul.f32 %v2620_v57, %v2015_v56 }
 0xd8d   : > { %v2025_v61 = vmul.f32 %v2247_v58, %v2018_v59 }
 0xd8f   : > { %v2032_v62 = vadd.f32 %v2248_v60, %v2025_v61 }
 0xd91   : > { %2033 = vst [vmem:[%s754_s22] sm:$0xff] %v2032_v62 }
 0xd92 PF: > { %s3403_s30 = sld [smem:[#allocation12_spill]] }
 0xd98   : > { %s35_s3 = sadd.s32 1, %s3403_s30  }
 0xd99   : > { %p32_p6 = scmp.ge.s32.totalorder %s35_s3, 4  }
 0xd9b   :  { %34 = sbr.rel (!%p32_p6) target bundleno = 15 (0xf), region = 158 }
 0xda2   :  { %2053 = vsyncpa [#allocation3], 1 }
 0xda3   :  { %2055 = vsyncpa [#allocation3 + $0x1], 1 }
 0xda4   :  { %2056 = vsyncpa [#allocation5], 1 }
 0xda5   :  { %2057 = vsyncpa [#allocation8], 1 }

</bundles_post_ra>
